<compile_context>
chip_gen: v5e
topology: v5e:2x2
jax: 0.10.0
libtpu: 0.0.40
codegen_flags: <defaults>
</compile_context>

<pallas_src>
import functools

import jax
import jax.numpy as jnp
from jax import lax
from jax.experimental import pallas as pl
from jax.experimental.pallas import tpu as pltpu


def _gat_conv(x, add_mask, w, a_src, a_dst, bias, *, heads, out_ch, concat):
    """Full multi-head GATConv on VMEM-resident values.

    x: (N, F_in) f32;  add_mask: (N, N) additive mask (0 on edges, -1e30 off);
    w: (F_in, heads*out_ch);  a_src / a_dst: (1, heads*out_ch);
    bias: (1, heads*out_ch) if concat else (1, out_ch).
    Returns (N, heads*out_ch) if concat else (N, out_ch).
    """
    # Fused per-head linear projection on the MXU (bf16 operands, f32 accumulate).
    h_all = jnp.dot(x.astype(jnp.bfloat16), w.astype(jnp.bfloat16),
                    preferred_element_type=jnp.float32)              # (N, H*C) f32

    head_outs = []
    for h in range(heads):                                            # static unroll (H <= 8)
        sl = slice(h * out_ch, (h + 1) * out_ch)
        hc = h_all[:, sl]                                             # (N, C) f32
        hc_bf = hc.astype(jnp.bfloat16)

        # alpha_dst[i] = <h_i, att_dst>  -> column (N, 1)   (VPU reduce)
        a_d = jnp.sum(hc * a_dst[:, sl], axis=-1, keepdims=True)
        # alpha_src as a row (1, N) straight off the MXU (no XLU transpose).
        a_s = lax.dot_general(a_src[:, sl].astype(jnp.bfloat16), hc_bf,
                              (((1,), (1,)), ((), ())),
                              preferred_element_type=jnp.float32)     # (1, N)

        # e[i, j] = LeakyReLU(alpha_dst[i] + alpha_src[j]), slope 0.2 (PyG default)
        logits = a_d + a_s                                            # (N_dst, N_src)
        logits = jnp.where(logits > 0, logits, 0.2 * logits)
        e = logits + add_mask                                         # additive -inf mask
        e = e - jnp.max(e, axis=-1, keepdims=True)
        p = jnp.exp(e)
        attn = p * pl.reciprocal(jnp.sum(p, axis=-1, keepdims=True), approx=True)

        # out_i = sum_j attn[i, j] * h_j   (MXU, bf16 operands, f32 accumulate)
        head_outs.append(jnp.dot(attn.astype(jnp.bfloat16), hc_bf,
                                 preferred_element_type=jnp.float32))  # (N, C)

    if concat:
        out = head_outs[0] if heads == 1 else jnp.concatenate(head_outs, axis=-1)
    else:                                                             # mean over heads
        out = head_outs[0]
        for y in head_outs[1:]:
            out = out + y
        out = out * (1.0 / heads)
    return out + bias


def _gat_model_kernel(x_ref, mask_ref,
                      w1_ref, as1_ref, ad1_ref, b1_ref,
                      w2_ref, as2_ref, ad2_ref, b2_ref,
                      out_ref, *, heads1, hidden, heads2, out_dim):
    x = x_ref[...]
    add_mask = mask_ref[...]

    # F.dropout(x) -> identity (inference)
    x1 = _gat_conv(x, add_mask, w1_ref[...], as1_ref[...], ad1_ref[...], b1_ref[...],
                   heads=heads1, out_ch=hidden, concat=True)          # (N, heads1*hidden)
    # F.elu (overflow-safe form)
    x1 = jnp.where(x1 > 0, x1, jnp.exp(jnp.minimum(x1, 0.0)) - 1.0)
    # F.dropout(x1) -> identity (inference)
    x2 = _gat_conv(x1, add_mask, w2_ref[...], as2_ref[...], ad2_ref[...], b2_ref[...],
                   heads=heads2, out_ch=out_dim, concat=False)        # (N, out_dim)

    # F.log_softmax(dim=1)
    z = x2 - jnp.max(x2, axis=-1, keepdims=True)
    out_ref[...] = (z - jnp.log(jnp.sum(jnp.exp(z), axis=-1, keepdims=True))
                    ).astype(out_ref.dtype)


def gat_model_forward(x, adj, params, *, heads1=8, heads2=1):
    """x: (N, F_in) f32; adj: dense (N, N) adjacency with adj[dst, src]=1 and self loops."""
    n = x.shape[0]
    hidden = params["b1"].shape[-1] // heads1
    out_dim = params["b2"].shape[-1]

    # Additive edge mask (bf16: the only O(N^2) input -> half the DMA traffic).
    add_mask = jnp.where(adj > 0, 0.0, -1e30).astype(jnp.bfloat16)

    kernel = functools.partial(_gat_model_kernel, heads1=heads1, hidden=hidden,
                               heads2=heads2, out_dim=out_dim)
    # Single invocation (no grid): everything fits in VMEM at these sizes.
    # TODO(synk): for large graphs, tile the destination dimension (grid over dst rows,
    # mask block (tile_dst, N), mark "parallel" so v7x's 2 TCs split it).
    return pl.pallas_call(
        kernel,
        out_shape=jax.ShapeDtypeStruct((n, out_dim), jnp.float32),
        compiler_params=pltpu.CompilerParams(vmem_limit_bytes=64 << 20),
    )(x, add_mask,
      params["w1"], params["a_src1"], params["a_dst1"], params["b1"],
      params["w2"], params["a_src2"], params["a_dst2"], params["b2"])


def init_params(key, input_dim, hidden_dim, output_dim, heads1=8, heads2=1):
    ks = jax.random.split(key, 6)

    def glorot(k, shape, fan_in, fan_out):
        lim = jnp.sqrt(6.0 / (fan_in + fan_out))
        return jax.random.uniform(k, shape, jnp.float32, -lim, lim)

    return dict(
        # conv1: in=input_dim, out=hidden_dim, heads=heads1, concat=True.
        # Weights are stored head-fused: w1[:, h*C:(h+1)*C] is head h's (F_in, C) matrix.
        w1=glorot(ks[0], (input_dim, heads1 * hidden_dim),
                  input_dim, heads1 * hidden_dim),
        a_src1=glorot(ks[1], (1, heads1 * hidden_dim), hidden_dim, 1),
        a_dst1=glorot(ks[2], (1, heads1 * hidden_dim), hidden_dim, 1),
        b1=jnp.zeros((1, heads1 * hidden_dim), jnp.float32),
        # conv2: in=hidden_dim*heads1, out=output_dim, heads=heads2, concat=False.
        w2=glorot(ks[3], (hidden_dim * heads1, heads2 * output_dim),
                  hidden_dim * heads1, heads2 * output_dim),
        a_src2=glorot(ks[4], (1, heads2 * output_dim), output_dim, 1),
        a_dst2=glorot(ks[5], (1, heads2 * output_dim), output_dim, 1),
        b2=jnp.zeros((1, output_dim), jnp.float32),   # concat=False -> single (out,) bias
    )


if __name__ == "__main__":
    N = 16
    input_dim, hidden_dim, output_dim = 16, 8, 4
    heads1, heads2 = 8, 1

    key = jax.random.PRNGKey(0)
    kx, kp = jax.random.split(key)
    x = jax.random.normal(kx, (N, input_dim), jnp.float32)

    # deterministic bidirectional ring graph: edge_index = [src; dst]
    src = jnp.arange(N, dtype=jnp.int32)
    dst = (src + 1) % N
    edge_src = jnp.concatenate([src, dst])
    edge_dst = jnp.concatenate([dst, src])

    # dense adjacency adj[dst, src] = 1, plus self loops (GATConv add_self_loops=True)
    adj = jnp.zeros((N, N), jnp.float32).at[edge_dst, edge_src].set(1.0)
    adj = jnp.maximum(adj, jnp.eye(N, dtype=jnp.float32))

    params = init_params(kp, input_dim, hidden_dim, output_dim, heads1, heads2)

    out = gat_model_forward(x, adj, params, heads1=heads1, heads2=heads2)
    out = jax.block_until_ready(out)
    assert out.shape == (N, output_dim)
    assert bool(jnp.all(jnp.isfinite(out)))
    print("KERNEL_OK")
</pallas_src>

<mosaic_0001>
module attributes {stable_mosaic.version = 11 : i64} {
  func.func @_gat_model_kernel(%arg0: memref<16x16xf32, #tpu.memory_space<vmem>>, %arg1: memref<16x16xbf16, #tpu.memory_space<vmem>>, %arg2: memref<16x64xf32, #tpu.memory_space<vmem>>, %arg3: memref<1x64xf32, #tpu.memory_space<vmem>>, %arg4: memref<1x64xf32, #tpu.memory_space<vmem>>, %arg5: memref<1x64xf32, #tpu.memory_space<vmem>>, %arg6: memref<64x4xf32, #tpu.memory_space<vmem>>, %arg7: memref<1x4xf32, #tpu.memory_space<vmem>>, %arg8: memref<1x4xf32, #tpu.memory_space<vmem>>, %arg9: memref<1x4xf32, #tpu.memory_space<vmem>>, %arg10: memref<16x4xf32, #tpu.memory_space<vmem>>) attributes {dimension_semantics = [], scalar_prefetch = 0 : i64, scratch_operands = 0 : i64, tpu.core_type = #tpu.core_type<tc>} {
    %c0 = arith.constant 0 : index
    %c0_0 = arith.constant 0 : index
    %0 = vector.load %arg0[%c0, %c0_0] : memref<16x16xf32, #tpu.memory_space<vmem>>, vector<16x16xf32>
    %c0_1 = arith.constant 0 : index
    %c0_2 = arith.constant 0 : index
    %1 = vector.load %arg1[%c0_1, %c0_2] : memref<16x16xbf16, #tpu.memory_space<vmem>>, vector<16x16xbf16>
    %c0_3 = arith.constant 0 : index
    %c0_4 = arith.constant 0 : index
    %2 = vector.load %arg2[%c0_3, %c0_4] : memref<16x64xf32, #tpu.memory_space<vmem>>, vector<16x64xf32>
    %c0_5 = arith.constant 0 : index
    %c0_6 = arith.constant 0 : index
    %3 = vector.load %arg3[%c0_5, %c0_6] : memref<1x64xf32, #tpu.memory_space<vmem>>, vector<1x64xf32>
    %c0_7 = arith.constant 0 : index
    %c0_8 = arith.constant 0 : index
    %4 = vector.load %arg4[%c0_7, %c0_8] : memref<1x64xf32, #tpu.memory_space<vmem>>, vector<1x64xf32>
    %c0_9 = arith.constant 0 : index
    %c0_10 = arith.constant 0 : index
    %5 = vector.load %arg5[%c0_9, %c0_10] : memref<1x64xf32, #tpu.memory_space<vmem>>, vector<1x64xf32>
    %6 = arith.truncf %0 : vector<16x16xf32> to vector<16x16xbf16>
    %7 = arith.truncf %2 : vector<16x64xf32> to vector<16x64xbf16>
    %cst = arith.constant dense<0.000000e+00> : vector<16x64xf32>
    %8 = tpu.matmul %6, %7, %cst {dimension_numbers = #tpu.dot_dimension_numbers<[1], [0], [0], [1], [0, 0, 1, 1], [], []>} : vector<16x16xbf16>, vector<16x64xbf16>, vector<16x64xf32> -> vector<16x64xf32>
    %9 = vector.extract_strided_slice %8 {offsets = [0, 0], sizes = [16, 8], strides = [1, 1]} : vector<16x64xf32> to vector<16x8xf32>
    %10 = arith.truncf %9 : vector<16x8xf32> to vector<16x8xbf16>
    %11 = vector.extract_strided_slice %4 {offsets = [0, 0], sizes = [1, 8], strides = [1, 1]} : vector<1x64xf32> to vector<1x8xf32>
    %12 = vector.broadcast %11 : vector<1x8xf32> to vector<16x8xf32>
    %13 = arith.mulf %9, %12 : vector<16x8xf32>
    %cst_11 = arith.constant dense<0.000000e+00> : vector<16xf32>
    %14 = vector.multi_reduction <add>, %13, %cst_11 [1] : vector<16x8xf32> to vector<16xf32>
    %15 = vector.shape_cast %14 : vector<16xf32> to vector<16x1xf32>
    %16 = vector.extract_strided_slice %3 {offsets = [0, 0], sizes = [1, 8], strides = [1, 1]} : vector<1x64xf32> to vector<1x8xf32>
    %17 = arith.truncf %16 : vector<1x8xf32> to vector<1x8xbf16>
    %cst_12 = arith.constant dense<0.000000e+00> : vector<1x16xf32>
    %18 = tpu.matmul %17, %10, %cst_12 {dimension_numbers = #tpu.dot_dimension_numbers<[1], [1], [0], [0], [0, 0, 1, 0], [], []>} : vector<1x8xbf16>, vector<16x8xbf16>, vector<1x16xf32> -> vector<1x16xf32>
    %19 = vector.broadcast %15 : vector<16x1xf32> to vector<16x16xf32>
    %20 = vector.broadcast %18 : vector<1x16xf32> to vector<16x16xf32>
    %21 = arith.addf %19, %20 : vector<16x16xf32>
    %cst_13 = arith.constant 0.000000e+00 : f32
    %22 = vector.broadcast %cst_13 : f32 to vector<16x16xf32>
    %23 = arith.cmpf ogt, %21, %22 : vector<16x16xf32>
    %cst_14 = arith.constant 2.000000e-01 : f32
    %24 = vector.broadcast %cst_14 : f32 to vector<16x16xf32>
    %25 = arith.mulf %24, %21 : vector<16x16xf32>
    %26 = arith.select %23, %21, %25 : vector<16x16xi1>, vector<16x16xf32>
    %27 = arith.extf %1 : vector<16x16xbf16> to vector<16x16xf32>
    %28 = arith.addf %26, %27 : vector<16x16xf32>
    %cst_15 = arith.constant dense<0xFF800000> : vector<16xf32>
    %29 = vector.multi_reduction <maximumf>, %28, %cst_15 [1] : vector<16x16xf32> to vector<16xf32>
    %30 = vector.shape_cast %29 : vector<16xf32> to vector<16x1xf32>
    %31 = vector.broadcast %30 : vector<16x1xf32> to vector<16x16xf32>
    %32 = arith.subf %28, %31 : vector<16x16xf32>
    %33 = math.exp %32 : vector<16x16xf32>
    %cst_16 = arith.constant dense<0.000000e+00> : vector<16xf32>
    %34 = vector.multi_reduction <add>, %33, %cst_16 [1] : vector<16x16xf32> to vector<16xf32>
    %35 = vector.shape_cast %34 : vector<16xf32> to vector<16x1xf32>
    %36 = tpu.reciprocal %35 {approx = true} : vector<16x1xf32> -> vector<16x1xf32>
    %37 = vector.broadcast %36 : vector<16x1xf32> to vector<16x16xf32>
    %38 = arith.mulf %33, %37 : vector<16x16xf32>
    %39 = arith.truncf %38 : vector<16x16xf32> to vector<16x16xbf16>
    %cst_17 = arith.constant dense<0.000000e+00> : vector<16x8xf32>
    %40 = tpu.matmul %39, %10, %cst_17 {dimension_numbers = #tpu.dot_dimension_numbers<[1], [0], [0], [1], [0, 0, 1, 1], [], []>} : vector<16x16xbf16>, vector<16x8xbf16>, vector<16x8xf32> -> vector<16x8xf32>
    %41 = vector.extract_strided_slice %8 {offsets = [0, 8], sizes = [16, 8], strides = [1, 1]} : vector<16x64xf32> to vector<16x8xf32>
    %42 = arith.truncf %41 : vector<16x8xf32> to vector<16x8xbf16>
    %43 = vector.extract_strided_slice %4 {offsets = [0, 8], sizes = [1, 8], strides = [1, 1]} : vector<1x64xf32> to vector<1x8xf32>
    %44 = vector.broadcast %43 : vector<1x8xf32> to vector<16x8xf32>
    %45 = arith.mulf %41, %44 : vector<16x8xf32>
    %cst_18 = arith.constant dense<0.000000e+00> : vector<16xf32>
    %46 = vector.multi_reduction <add>, %45, %cst_18 [1] : vector<16x8xf32> to vector<16xf32>
    %47 = vector.shape_cast %46 : vector<16xf32> to vector<16x1xf32>
    %48 = vector.extract_strided_slice %3 {offsets = [0, 8], sizes = [1, 8], strides = [1, 1]} : vector<1x64xf32> to vector<1x8xf32>
    %49 = arith.truncf %48 : vector<1x8xf32> to vector<1x8xbf16>
    %cst_19 = arith.constant dense<0.000000e+00> : vector<1x16xf32>
    %50 = tpu.matmul %49, %42, %cst_19 {dimension_numbers = #tpu.dot_dimension_numbers<[1], [1], [0], [0], [0, 0, 1, 0], [], []>} : vector<1x8xbf16>, vector<16x8xbf16>, vector<1x16xf32> -> vector<1x16xf32>
    %51 = vector.broadcast %47 : vector<16x1xf32> to vector<16x16xf32>
    %52 = vector.broadcast %50 : vector<1x16xf32> to vector<16x16xf32>
    %53 = arith.addf %51, %52 : vector<16x16xf32>
    %cst_20 = arith.constant 0.000000e+00 : f32
    %54 = vector.broadcast %cst_20 : f32 to vector<16x16xf32>
    %55 = arith.cmpf ogt, %53, %54 : vector<16x16xf32>
    %cst_21 = arith.constant 2.000000e-01 : f32
    %56 = vector.broadcast %cst_21 : f32 to vector<16x16xf32>
    %57 = arith.mulf %56, %53 : vector<16x16xf32>
    %58 = arith.select %55, %53, %57 : vector<16x16xi1>, vector<16x16xf32>
    %59 = arith.extf %1 : vector<16x16xbf16> to vector<16x16xf32>
    %60 = arith.addf %58, %59 : vector<16x16xf32>
    %cst_22 = arith.constant dense<0xFF800000> : vector<16xf32>
    %61 = vector.multi_reduction <maximumf>, %60, %cst_22 [1] : vector<16x16xf32> to vector<16xf32>
    %62 = vector.shape_cast %61 : vector<16xf32> to vector<16x1xf32>
    %63 = vector.broadcast %62 : vector<16x1xf32> to vector<16x16xf32>
    %64 = arith.subf %60, %63 : vector<16x16xf32>
    %65 = math.exp %64 : vector<16x16xf32>
    %cst_23 = arith.constant dense<0.000000e+00> : vector<16xf32>
    %66 = vector.multi_reduction <add>, %65, %cst_23 [1] : vector<16x16xf32> to vector<16xf32>
    %67 = vector.shape_cast %66 : vector<16xf32> to vector<16x1xf32>
    %68 = tpu.reciprocal %67 {approx = true} : vector<16x1xf32> -> vector<16x1xf32>
    %69 = vector.broadcast %68 : vector<16x1xf32> to vector<16x16xf32>
    %70 = arith.mulf %65, %69 : vector<16x16xf32>
    %71 = arith.truncf %70 : vector<16x16xf32> to vector<16x16xbf16>
    %cst_24 = arith.constant dense<0.000000e+00> : vector<16x8xf32>
    %72 = tpu.matmul %71, %42, %cst_24 {dimension_numbers = #tpu.dot_dimension_numbers<[1], [0], [0], [1], [0, 0, 1, 1], [], []>} : vector<16x16xbf16>, vector<16x8xbf16>, vector<16x8xf32> -> vector<16x8xf32>
    %73 = vector.extract_strided_slice %8 {offsets = [0, 16], sizes = [16, 8], strides = [1, 1]} : vector<16x64xf32> to vector<16x8xf32>
    %74 = arith.truncf %73 : vector<16x8xf32> to vector<16x8xbf16>
    %75 = vector.extract_strided_slice %4 {offsets = [0, 16], sizes = [1, 8], strides = [1, 1]} : vector<1x64xf32> to vector<1x8xf32>
    %76 = vector.broadcast %75 : vector<1x8xf32> to vector<16x8xf32>
    %77 = arith.mulf %73, %76 : vector<16x8xf32>
    %cst_25 = arith.constant dense<0.000000e+00> : vector<16xf32>
    %78 = vector.multi_reduction <add>, %77, %cst_25 [1] : vector<16x8xf32> to vector<16xf32>
    %79 = vector.shape_cast %78 : vector<16xf32> to vector<16x1xf32>
    %80 = vector.extract_strided_slice %3 {offsets = [0, 16], sizes = [1, 8], strides = [1, 1]} : vector<1x64xf32> to vector<1x8xf32>
    %81 = arith.truncf %80 : vector<1x8xf32> to vector<1x8xbf16>
    %cst_26 = arith.constant dense<0.000000e+00> : vector<1x16xf32>
    %82 = tpu.matmul %81, %74, %cst_26 {dimension_numbers = #tpu.dot_dimension_numbers<[1], [1], [0], [0], [0, 0, 1, 0], [], []>} : vector<1x8xbf16>, vector<16x8xbf16>, vector<1x16xf32> -> vector<1x16xf32>
    %83 = vector.broadcast %79 : vector<16x1xf32> to vector<16x16xf32>
    %84 = vector.broadcast %82 : vector<1x16xf32> to vector<16x16xf32>
    %85 = arith.addf %83, %84 : vector<16x16xf32>
    %cst_27 = arith.constant 0.000000e+00 : f32
    %86 = vector.broadcast %cst_27 : f32 to vector<16x16xf32>
    %87 = arith.cmpf ogt, %85, %86 : vector<16x16xf32>
    %cst_28 = arith.constant 2.000000e-01 : f32
    %88 = vector.broadcast %cst_28 : f32 to vector<16x16xf32>
    %89 = arith.mulf %88, %85 : vector<16x16xf32>
    %90 = arith.select %87, %85, %89 : vector<16x16xi1>, vector<16x16xf32>
    %91 = arith.extf %1 : vector<16x16xbf16> to vector<16x16xf32>
    %92 = arith.addf %90, %91 : vector<16x16xf32>
    %cst_29 = arith.constant dense<0xFF800000> : vector<16xf32>
    %93 = vector.multi_reduction <maximumf>, %92, %cst_29 [1] : vector<16x16xf32> to vector<16xf32>
    %94 = vector.shape_cast %93 : vector<16xf32> to vector<16x1xf32>
    %95 = vector.broadcast %94 : vector<16x1xf32> to vector<16x16xf32>
    %96 = arith.subf %92, %95 : vector<16x16xf32>
    %97 = math.exp %96 : vector<16x16xf32>
    %cst_30 = arith.constant dense<0.000000e+00> : vector<16xf32>
    %98 = vector.multi_reduction <add>, %97, %cst_30 [1] : vector<16x16xf32> to vector<16xf32>
    %99 = vector.shape_cast %98 : vector<16xf32> to vector<16x1xf32>
    %100 = tpu.reciprocal %99 {approx = true} : vector<16x1xf32> -> vector<16x1xf32>
    %101 = vector.broadcast %100 : vector<16x1xf32> to vector<16x16xf32>
    %102 = arith.mulf %97, %101 : vector<16x16xf32>
    %103 = arith.truncf %102 : vector<16x16xf32> to vector<16x16xbf16>
    %cst_31 = arith.constant dense<0.000000e+00> : vector<16x8xf32>
    %104 = tpu.matmul %103, %74, %cst_31 {dimension_numbers = #tpu.dot_dimension_numbers<[1], [0], [0], [1], [0, 0, 1, 1], [], []>} : vector<16x16xbf16>, vector<16x8xbf16>, vector<16x8xf32> -> vector<16x8xf32>
    %105 = vector.extract_strided_slice %8 {offsets = [0, 24], sizes = [16, 8], strides = [1, 1]} : vector<16x64xf32> to vector<16x8xf32>
    %106 = arith.truncf %105 : vector<16x8xf32> to vector<16x8xbf16>
    %107 = vector.extract_strided_slice %4 {offsets = [0, 24], sizes = [1, 8], strides = [1, 1]} : vector<1x64xf32> to vector<1x8xf32>
    %108 = vector.broadcast %107 : vector<1x8xf32> to vector<16x8xf32>
    %109 = arith.mulf %105, %108 : vector<16x8xf32>
    %cst_32 = arith.constant dense<0.000000e+00> : vector<16xf32>
    %110 = vector.multi_reduction <add>, %109, %cst_32 [1] : vector<16x8xf32> to vector<16xf32>
    %111 = vector.shape_cast %110 : vector<16xf32> to vector<16x1xf32>
    %112 = vector.extract_strided_slice %3 {offsets = [0, 24], sizes = [1, 8], strides = [1, 1]} : vector<1x64xf32> to vector<1x8xf32>
    %113 = arith.truncf %112 : vector<1x8xf32> to vector<1x8xbf16>
    %cst_33 = arith.constant dense<0.000000e+00> : vector<1x16xf32>
    %114 = tpu.matmul %113, %106, %cst_33 {dimension_numbers = #tpu.dot_dimension_numbers<[1], [1], [0], [0], [0, 0, 1, 0], [], []>} : vector<1x8xbf16>, vector<16x8xbf16>, vector<1x16xf32> -> vector<1x16xf32>
    %115 = vector.broadcast %111 : vector<16x1xf32> to vector<16x16xf32>
    %116 = vector.broadcast %114 : vector<1x16xf32> to vector<16x16xf32>
    %117 = arith.addf %115, %116 : vector<16x16xf32>
    %cst_34 = arith.constant 0.000000e+00 : f32
    %118 = vector.broadcast %cst_34 : f32 to vector<16x16xf32>
    %119 = arith.cmpf ogt, %117, %118 : vector<16x16xf32>
    %cst_35 = arith.constant 2.000000e-01 : f32
    %120 = vector.broadcast %cst_35 : f32 to vector<16x16xf32>
    %121 = arith.mulf %120, %117 : vector<16x16xf32>
    %122 = arith.select %119, %117, %121 : vector<16x16xi1>, vector<16x16xf32>
    %123 = arith.extf %1 : vector<16x16xbf16> to vector<16x16xf32>
    %124 = arith.addf %122, %123 : vector<16x16xf32>
    %cst_36 = arith.constant dense<0xFF800000> : vector<16xf32>
    %125 = vector.multi_reduction <maximumf>, %124, %cst_36 [1] : vector<16x16xf32> to vector<16xf32>
    %126 = vector.shape_cast %125 : vector<16xf32> to vector<16x1xf32>
    %127 = vector.broadcast %126 : vector<16x1xf32> to vector<16x16xf32>
    %128 = arith.subf %124, %127 : vector<16x16xf32>
    %129 = math.exp %128 : vector<16x16xf32>
    %cst_37 = arith.constant dense<0.000000e+00> : vector<16xf32>
    %130 = vector.multi_reduction <add>, %129, %cst_37 [1] : vector<16x16xf32> to vector<16xf32>
    %131 = vector.shape_cast %130 : vector<16xf32> to vector<16x1xf32>
    %132 = tpu.reciprocal %131 {approx = true} : vector<16x1xf32> -> vector<16x1xf32>
    %133 = vector.broadcast %132 : vector<16x1xf32> to vector<16x16xf32>
    %134 = arith.mulf %129, %133 : vector<16x16xf32>
    %135 = arith.truncf %134 : vector<16x16xf32> to vector<16x16xbf16>
    %cst_38 = arith.constant dense<0.000000e+00> : vector<16x8xf32>
    %136 = tpu.matmul %135, %106, %cst_38 {dimension_numbers = #tpu.dot_dimension_numbers<[1], [0], [0], [1], [0, 0, 1, 1], [], []>} : vector<16x16xbf16>, vector<16x8xbf16>, vector<16x8xf32> -> vector<16x8xf32>
    %137 = vector.extract_strided_slice %8 {offsets = [0, 32], sizes = [16, 8], strides = [1, 1]} : vector<16x64xf32> to vector<16x8xf32>
    %138 = arith.truncf %137 : vector<16x8xf32> to vector<16x8xbf16>
    %139 = vector.extract_strided_slice %4 {offsets = [0, 32], sizes = [1, 8], strides = [1, 1]} : vector<1x64xf32> to vector<1x8xf32>
    %140 = vector.broadcast %139 : vector<1x8xf32> to vector<16x8xf32>
    %141 = arith.mulf %137, %140 : vector<16x8xf32>
    %cst_39 = arith.constant dense<0.000000e+00> : vector<16xf32>
    %142 = vector.multi_reduction <add>, %141, %cst_39 [1] : vector<16x8xf32> to vector<16xf32>
    %143 = vector.shape_cast %142 : vector<16xf32> to vector<16x1xf32>
    %144 = vector.extract_strided_slice %3 {offsets = [0, 32], sizes = [1, 8], strides = [1, 1]} : vector<1x64xf32> to vector<1x8xf32>
    %145 = arith.truncf %144 : vector<1x8xf32> to vector<1x8xbf16>
    %cst_40 = arith.constant dense<0.000000e+00> : vector<1x16xf32>
    %146 = tpu.matmul %145, %138, %cst_40 {dimension_numbers = #tpu.dot_dimension_numbers<[1], [1], [0], [0], [0, 0, 1, 0], [], []>} : vector<1x8xbf16>, vector<16x8xbf16>, vector<1x16xf32> -> vector<1x16xf32>
    %147 = vector.broadcast %143 : vector<16x1xf32> to vector<16x16xf32>
    %148 = vector.broadcast %146 : vector<1x16xf32> to vector<16x16xf32>
    %149 = arith.addf %147, %148 : vector<16x16xf32>
    %cst_41 = arith.constant 0.000000e+00 : f32
    %150 = vector.broadcast %cst_41 : f32 to vector<16x16xf32>
    %151 = arith.cmpf ogt, %149, %150 : vector<16x16xf32>
    %cst_42 = arith.constant 2.000000e-01 : f32
    %152 = vector.broadcast %cst_42 : f32 to vector<16x16xf32>
    %153 = arith.mulf %152, %149 : vector<16x16xf32>
    %154 = arith.select %151, %149, %153 : vector<16x16xi1>, vector<16x16xf32>
    %155 = arith.extf %1 : vector<16x16xbf16> to vector<16x16xf32>
    %156 = arith.addf %154, %155 : vector<16x16xf32>
    %cst_43 = arith.constant dense<0xFF800000> : vector<16xf32>
    %157 = vector.multi_reduction <maximumf>, %156, %cst_43 [1] : vector<16x16xf32> to vector<16xf32>
    %158 = vector.shape_cast %157 : vector<16xf32> to vector<16x1xf32>
    %159 = vector.broadcast %158 : vector<16x1xf32> to vector<16x16xf32>
    %160 = arith.subf %156, %159 : vector<16x16xf32>
    %161 = math.exp %160 : vector<16x16xf32>
    %cst_44 = arith.constant dense<0.000000e+00> : vector<16xf32>
    %162 = vector.multi_reduction <add>, %161, %cst_44 [1] : vector<16x16xf32> to vector<16xf32>
    %163 = vector.shape_cast %162 : vector<16xf32> to vector<16x1xf32>
    %164 = tpu.reciprocal %163 {approx = true} : vector<16x1xf32> -> vector<16x1xf32>
    %165 = vector.broadcast %164 : vector<16x1xf32> to vector<16x16xf32>
    %166 = arith.mulf %161, %165 : vector<16x16xf32>
    %167 = arith.truncf %166 : vector<16x16xf32> to vector<16x16xbf16>
    %cst_45 = arith.constant dense<0.000000e+00> : vector<16x8xf32>
    %168 = tpu.matmul %167, %138, %cst_45 {dimension_numbers = #tpu.dot_dimension_numbers<[1], [0], [0], [1], [0, 0, 1, 1], [], []>} : vector<16x16xbf16>, vector<16x8xbf16>, vector<16x8xf32> -> vector<16x8xf32>
    %169 = vector.extract_strided_slice %8 {offsets = [0, 40], sizes = [16, 8], strides = [1, 1]} : vector<16x64xf32> to vector<16x8xf32>
    %170 = arith.truncf %169 : vector<16x8xf32> to vector<16x8xbf16>
    %171 = vector.extract_strided_slice %4 {offsets = [0, 40], sizes = [1, 8], strides = [1, 1]} : vector<1x64xf32> to vector<1x8xf32>
    %172 = vector.broadcast %171 : vector<1x8xf32> to vector<16x8xf32>
    %173 = arith.mulf %169, %172 : vector<16x8xf32>
    %cst_46 = arith.constant dense<0.000000e+00> : vector<16xf32>
    %174 = vector.multi_reduction <add>, %173, %cst_46 [1] : vector<16x8xf32> to vector<16xf32>
    %175 = vector.shape_cast %174 : vector<16xf32> to vector<16x1xf32>
    %176 = vector.extract_strided_slice %3 {offsets = [0, 40], sizes = [1, 8], strides = [1, 1]} : vector<1x64xf32> to vector<1x8xf32>
    %177 = arith.truncf %176 : vector<1x8xf32> to vector<1x8xbf16>
    %cst_47 = arith.constant dense<0.000000e+00> : vector<1x16xf32>
    %178 = tpu.matmul %177, %170, %cst_47 {dimension_numbers = #tpu.dot_dimension_numbers<[1], [1], [0], [0], [0, 0, 1, 0], [], []>} : vector<1x8xbf16>, vector<16x8xbf16>, vector<1x16xf32> -> vector<1x16xf32>
    %179 = vector.broadcast %175 : vector<16x1xf32> to vector<16x16xf32>
    %180 = vector.broadcast %178 : vector<1x16xf32> to vector<16x16xf32>
    %181 = arith.addf %179, %180 : vector<16x16xf32>
    %cst_48 = arith.constant 0.000000e+00 : f32
    %182 = vector.broadcast %cst_48 : f32 to vector<16x16xf32>
    %183 = arith.cmpf ogt, %181, %182 : vector<16x16xf32>
    %cst_49 = arith.constant 2.000000e-01 : f32
    %184 = vector.broadcast %cst_49 : f32 to vector<16x16xf32>
    %185 = arith.mulf %184, %181 : vector<16x16xf32>
    %186 = arith.select %183, %181, %185 : vector<16x16xi1>, vector<16x16xf32>
    %187 = arith.extf %1 : vector<16x16xbf16> to vector<16x16xf32>
    %188 = arith.addf %186, %187 : vector<16x16xf32>
    %cst_50 = arith.constant dense<0xFF800000> : vector<16xf32>
    %189 = vector.multi_reduction <maximumf>, %188, %cst_50 [1] : vector<16x16xf32> to vector<16xf32>
    %190 = vector.shape_cast %189 : vector<16xf32> to vector<16x1xf32>
    %191 = vector.broadcast %190 : vector<16x1xf32> to vector<16x16xf32>
    %192 = arith.subf %188, %191 : vector<16x16xf32>
    %193 = math.exp %192 : vector<16x16xf32>
    %cst_51 = arith.constant dense<0.000000e+00> : vector<16xf32>
    %194 = vector.multi_reduction <add>, %193, %cst_51 [1] : vector<16x16xf32> to vector<16xf32>
    %195 = vector.shape_cast %194 : vector<16xf32> to vector<16x1xf32>
    %196 = tpu.reciprocal %195 {approx = true} : vector<16x1xf32> -> vector<16x1xf32>
    %197 = vector.broadcast %196 : vector<16x1xf32> to vector<16x16xf32>
    %198 = arith.mulf %193, %197 : vector<16x16xf32>
    %199 = arith.truncf %198 : vector<16x16xf32> to vector<16x16xbf16>
    %cst_52 = arith.constant dense<0.000000e+00> : vector<16x8xf32>
    %200 = tpu.matmul %199, %170, %cst_52 {dimension_numbers = #tpu.dot_dimension_numbers<[1], [0], [0], [1], [0, 0, 1, 1], [], []>} : vector<16x16xbf16>, vector<16x8xbf16>, vector<16x8xf32> -> vector<16x8xf32>
    %201 = vector.extract_strided_slice %8 {offsets = [0, 48], sizes = [16, 8], strides = [1, 1]} : vector<16x64xf32> to vector<16x8xf32>
    %202 = arith.truncf %201 : vector<16x8xf32> to vector<16x8xbf16>
    %203 = vector.extract_strided_slice %4 {offsets = [0, 48], sizes = [1, 8], strides = [1, 1]} : vector<1x64xf32> to vector<1x8xf32>
    %204 = vector.broadcast %203 : vector<1x8xf32> to vector<16x8xf32>
    %205 = arith.mulf %201, %204 : vector<16x8xf32>
    %cst_53 = arith.constant dense<0.000000e+00> : vector<16xf32>
    %206 = vector.multi_reduction <add>, %205, %cst_53 [1] : vector<16x8xf32> to vector<16xf32>
    %207 = vector.shape_cast %206 : vector<16xf32> to vector<16x1xf32>
    %208 = vector.extract_strided_slice %3 {offsets = [0, 48], sizes = [1, 8], strides = [1, 1]} : vector<1x64xf32> to vector<1x8xf32>
    %209 = arith.truncf %208 : vector<1x8xf32> to vector<1x8xbf16>
    %cst_54 = arith.constant dense<0.000000e+00> : vector<1x16xf32>
    %210 = tpu.matmul %209, %202, %cst_54 {dimension_numbers = #tpu.dot_dimension_numbers<[1], [1], [0], [0], [0, 0, 1, 0], [], []>} : vector<1x8xbf16>, vector<16x8xbf16>, vector<1x16xf32> -> vector<1x16xf32>
    %211 = vector.broadcast %207 : vector<16x1xf32> to vector<16x16xf32>
    %212 = vector.broadcast %210 : vector<1x16xf32> to vector<16x16xf32>
    %213 = arith.addf %211, %212 : vector<16x16xf32>
    %cst_55 = arith.constant 0.000000e+00 : f32
    %214 = vector.broadcast %cst_55 : f32 to vector<16x16xf32>
    %215 = arith.cmpf ogt, %213, %214 : vector<16x16xf32>
    %cst_56 = arith.constant 2.000000e-01 : f32
    %216 = vector.broadcast %cst_56 : f32 to vector<16x16xf32>
    %217 = arith.mulf %216, %213 : vector<16x16xf32>
    %218 = arith.select %215, %213, %217 : vector<16x16xi1>, vector<16x16xf32>
    %219 = arith.extf %1 : vector<16x16xbf16> to vector<16x16xf32>
    %220 = arith.addf %218, %219 : vector<16x16xf32>
    %cst_57 = arith.constant dense<0xFF800000> : vector<16xf32>
    %221 = vector.multi_reduction <maximumf>, %220, %cst_57 [1] : vector<16x16xf32> to vector<16xf32>
    %222 = vector.shape_cast %221 : vector<16xf32> to vector<16x1xf32>
    %223 = vector.broadcast %222 : vector<16x1xf32> to vector<16x16xf32>
    %224 = arith.subf %220, %223 : vector<16x16xf32>
    %225 = math.exp %224 : vector<16x16xf32>
    %cst_58 = arith.constant dense<0.000000e+00> : vector<16xf32>
    %226 = vector.multi_reduction <add>, %225, %cst_58 [1] : vector<16x16xf32> to vector<16xf32>
    %227 = vector.shape_cast %226 : vector<16xf32> to vector<16x1xf32>
    %228 = tpu.reciprocal %227 {approx = true} : vector<16x1xf32> -> vector<16x1xf32>
    %229 = vector.broadcast %228 : vector<16x1xf32> to vector<16x16xf32>
    %230 = arith.mulf %225, %229 : vector<16x16xf32>
    %231 = arith.truncf %230 : vector<16x16xf32> to vector<16x16xbf16>
    %cst_59 = arith.constant dense<0.000000e+00> : vector<16x8xf32>
    %232 = tpu.matmul %231, %202, %cst_59 {dimension_numbers = #tpu.dot_dimension_numbers<[1], [0], [0], [1], [0, 0, 1, 1], [], []>} : vector<16x16xbf16>, vector<16x8xbf16>, vector<16x8xf32> -> vector<16x8xf32>
    %233 = vector.extract_strided_slice %8 {offsets = [0, 56], sizes = [16, 8], strides = [1, 1]} : vector<16x64xf32> to vector<16x8xf32>
    %234 = arith.truncf %233 : vector<16x8xf32> to vector<16x8xbf16>
    %235 = vector.extract_strided_slice %4 {offsets = [0, 56], sizes = [1, 8], strides = [1, 1]} : vector<1x64xf32> to vector<1x8xf32>
    %236 = vector.broadcast %235 : vector<1x8xf32> to vector<16x8xf32>
    %237 = arith.mulf %233, %236 : vector<16x8xf32>
    %cst_60 = arith.constant dense<0.000000e+00> : vector<16xf32>
    %238 = vector.multi_reduction <add>, %237, %cst_60 [1] : vector<16x8xf32> to vector<16xf32>
    %239 = vector.shape_cast %238 : vector<16xf32> to vector<16x1xf32>
    %240 = vector.extract_strided_slice %3 {offsets = [0, 56], sizes = [1, 8], strides = [1, 1]} : vector<1x64xf32> to vector<1x8xf32>
    %241 = arith.truncf %240 : vector<1x8xf32> to vector<1x8xbf16>
    %cst_61 = arith.constant dense<0.000000e+00> : vector<1x16xf32>
    %242 = tpu.matmul %241, %234, %cst_61 {dimension_numbers = #tpu.dot_dimension_numbers<[1], [1], [0], [0], [0, 0, 1, 0], [], []>} : vector<1x8xbf16>, vector<16x8xbf16>, vector<1x16xf32> -> vector<1x16xf32>
    %243 = vector.broadcast %239 : vector<16x1xf32> to vector<16x16xf32>
    %244 = vector.broadcast %242 : vector<1x16xf32> to vector<16x16xf32>
    %245 = arith.addf %243, %244 : vector<16x16xf32>
    %cst_62 = arith.constant 0.000000e+00 : f32
    %246 = vector.broadcast %cst_62 : f32 to vector<16x16xf32>
    %247 = arith.cmpf ogt, %245, %246 : vector<16x16xf32>
    %cst_63 = arith.constant 2.000000e-01 : f32
    %248 = vector.broadcast %cst_63 : f32 to vector<16x16xf32>
    %249 = arith.mulf %248, %245 : vector<16x16xf32>
    %250 = arith.select %247, %245, %249 : vector<16x16xi1>, vector<16x16xf32>
    %251 = arith.extf %1 : vector<16x16xbf16> to vector<16x16xf32>
    %252 = arith.addf %250, %251 : vector<16x16xf32>
    %cst_64 = arith.constant dense<0xFF800000> : vector<16xf32>
    %253 = vector.multi_reduction <maximumf>, %252, %cst_64 [1] : vector<16x16xf32> to vector<16xf32>
    %254 = vector.shape_cast %253 : vector<16xf32> to vector<16x1xf32>
    %255 = vector.broadcast %254 : vector<16x1xf32> to vector<16x16xf32>
    %256 = arith.subf %252, %255 : vector<16x16xf32>
    %257 = math.exp %256 : vector<16x16xf32>
    %cst_65 = arith.constant dense<0.000000e+00> : vector<16xf32>
    %258 = vector.multi_reduction <add>, %257, %cst_65 [1] : vector<16x16xf32> to vector<16xf32>
    %259 = vector.shape_cast %258 : vector<16xf32> to vector<16x1xf32>
    %260 = tpu.reciprocal %259 {approx = true} : vector<16x1xf32> -> vector<16x1xf32>
    %261 = vector.broadcast %260 : vector<16x1xf32> to vector<16x16xf32>
    %262 = arith.mulf %257, %261 : vector<16x16xf32>
    %263 = arith.truncf %262 : vector<16x16xf32> to vector<16x16xbf16>
    %cst_66 = arith.constant dense<0.000000e+00> : vector<16x8xf32>
    %264 = tpu.matmul %263, %234, %cst_66 {dimension_numbers = #tpu.dot_dimension_numbers<[1], [0], [0], [1], [0, 0, 1, 1], [], []>} : vector<16x16xbf16>, vector<16x8xbf16>, vector<16x8xf32> -> vector<16x8xf32>
    %265 = tpu.concatenate %40, %72, %104, %136, %168, %200, %232, %264 in 1 : vector<16x8xf32>, vector<16x8xf32>, vector<16x8xf32>, vector<16x8xf32>, vector<16x8xf32>, vector<16x8xf32>, vector<16x8xf32>, vector<16x8xf32> -> vector<16x64xf32>
    %266 = vector.broadcast %5 : vector<1x64xf32> to vector<16x64xf32>
    %267 = arith.addf %265, %266 : vector<16x64xf32>
    %cst_67 = arith.constant 0.000000e+00 : f32
    %268 = vector.broadcast %cst_67 : f32 to vector<16x64xf32>
    %269 = arith.cmpf ogt, %267, %268 : vector<16x64xf32>
    %cst_68 = arith.constant 0.000000e+00 : f32
    %270 = vector.broadcast %cst_68 : f32 to vector<16x64xf32>
    %271 = arith.minimumf %267, %270 : vector<16x64xf32>
    %272 = math.exp %271 : vector<16x64xf32>
    %cst_69 = arith.constant 1.000000e+00 : f32
    %273 = vector.broadcast %cst_69 : f32 to vector<16x64xf32>
    %274 = arith.subf %272, %273 : vector<16x64xf32>
    %275 = arith.select %269, %267, %274 : vector<16x64xi1>, vector<16x64xf32>
    %c0_70 = arith.constant 0 : index
    %c0_71 = arith.constant 0 : index
    %276 = vector.load %arg6[%c0_70, %c0_71] : memref<64x4xf32, #tpu.memory_space<vmem>>, vector<64x4xf32>
    %c0_72 = arith.constant 0 : index
    %c0_73 = arith.constant 0 : index
    %277 = vector.load %arg7[%c0_72, %c0_73] : memref<1x4xf32, #tpu.memory_space<vmem>>, vector<1x4xf32>
    %c0_74 = arith.constant 0 : index
    %c0_75 = arith.constant 0 : index
    %278 = vector.load %arg8[%c0_74, %c0_75] : memref<1x4xf32, #tpu.memory_space<vmem>>, vector<1x4xf32>
    %c0_76 = arith.constant 0 : index
    %c0_77 = arith.constant 0 : index
    %279 = vector.load %arg9[%c0_76, %c0_77] : memref<1x4xf32, #tpu.memory_space<vmem>>, vector<1x4xf32>
    %280 = arith.truncf %275 : vector<16x64xf32> to vector<16x64xbf16>
    %281 = arith.truncf %276 : vector<64x4xf32> to vector<64x4xbf16>
    %cst_78 = arith.constant dense<0.000000e+00> : vector<16x4xf32>
    %282 = tpu.matmul %280, %281, %cst_78 {dimension_numbers = #tpu.dot_dimension_numbers<[1], [0], [0], [1], [0, 0, 1, 1], [], []>} : vector<16x64xbf16>, vector<64x4xbf16>, vector<16x4xf32> -> vector<16x4xf32>
    %283 = arith.truncf %282 : vector<16x4xf32> to vector<16x4xbf16>
    %284 = vector.broadcast %278 : vector<1x4xf32> to vector<16x4xf32>
    %285 = arith.mulf %282, %284 : vector<16x4xf32>
    %cst_79 = arith.constant dense<0.000000e+00> : vector<16xf32>
    %286 = vector.multi_reduction <add>, %285, %cst_79 [1] : vector<16x4xf32> to vector<16xf32>
    %287 = vector.shape_cast %286 : vector<16xf32> to vector<16x1xf32>
    %288 = arith.truncf %277 : vector<1x4xf32> to vector<1x4xbf16>
    %cst_80 = arith.constant dense<0.000000e+00> : vector<1x16xf32>
    %289 = tpu.matmul %288, %283, %cst_80 {dimension_numbers = #tpu.dot_dimension_numbers<[1], [1], [0], [0], [0, 0, 1, 0], [], []>} : vector<1x4xbf16>, vector<16x4xbf16>, vector<1x16xf32> -> vector<1x16xf32>
    %290 = vector.broadcast %287 : vector<16x1xf32> to vector<16x16xf32>
    %291 = vector.broadcast %289 : vector<1x16xf32> to vector<16x16xf32>
    %292 = arith.addf %290, %291 : vector<16x16xf32>
    %cst_81 = arith.constant 0.000000e+00 : f32
    %293 = vector.broadcast %cst_81 : f32 to vector<16x16xf32>
    %294 = arith.cmpf ogt, %292, %293 : vector<16x16xf32>
    %cst_82 = arith.constant 2.000000e-01 : f32
    %295 = vector.broadcast %cst_82 : f32 to vector<16x16xf32>
    %296 = arith.mulf %295, %292 : vector<16x16xf32>
    %297 = arith.select %294, %292, %296 : vector<16x16xi1>, vector<16x16xf32>
    %298 = arith.extf %1 : vector<16x16xbf16> to vector<16x16xf32>
    %299 = arith.addf %297, %298 : vector<16x16xf32>
    %cst_83 = arith.constant dense<0xFF800000> : vector<16xf32>
    %300 = vector.multi_reduction <maximumf>, %299, %cst_83 [1] : vector<16x16xf32> to vector<16xf32>
    %301 = vector.shape_cast %300 : vector<16xf32> to vector<16x1xf32>
    %302 = vector.broadcast %301 : vector<16x1xf32> to vector<16x16xf32>
    %303 = arith.subf %299, %302 : vector<16x16xf32>
    %304 = math.exp %303 : vector<16x16xf32>
    %cst_84 = arith.constant dense<0.000000e+00> : vector<16xf32>
    %305 = vector.multi_reduction <add>, %304, %cst_84 [1] : vector<16x16xf32> to vector<16xf32>
    %306 = vector.shape_cast %305 : vector<16xf32> to vector<16x1xf32>
    %307 = tpu.reciprocal %306 {approx = true} : vector<16x1xf32> -> vector<16x1xf32>
    %308 = vector.broadcast %307 : vector<16x1xf32> to vector<16x16xf32>
    %309 = arith.mulf %304, %308 : vector<16x16xf32>
    %310 = arith.truncf %309 : vector<16x16xf32> to vector<16x16xbf16>
    %cst_85 = arith.constant dense<0.000000e+00> : vector<16x4xf32>
    %311 = tpu.matmul %310, %283, %cst_85 {dimension_numbers = #tpu.dot_dimension_numbers<[1], [0], [0], [1], [0, 0, 1, 1], [], []>} : vector<16x16xbf16>, vector<16x4xbf16>, vector<16x4xf32> -> vector<16x4xf32>
    %cst_86 = arith.constant 1.000000e+00 : f32
    %312 = vector.broadcast %cst_86 : f32 to vector<16x4xf32>
    %313 = arith.mulf %311, %312 : vector<16x4xf32>
    %314 = vector.broadcast %279 : vector<1x4xf32> to vector<16x4xf32>
    %315 = arith.addf %313, %314 : vector<16x4xf32>
    %cst_87 = arith.constant dense<0xFF800000> : vector<16xf32>
    %316 = vector.multi_reduction <maximumf>, %315, %cst_87 [1] : vector<16x4xf32> to vector<16xf32>
    %317 = vector.shape_cast %316 : vector<16xf32> to vector<16x1xf32>
    %318 = vector.broadcast %317 : vector<16x1xf32> to vector<16x4xf32>
    %319 = arith.subf %315, %318 : vector<16x4xf32>
    %320 = math.exp %319 : vector<16x4xf32>
    %cst_88 = arith.constant dense<0.000000e+00> : vector<16xf32>
    %321 = vector.multi_reduction <add>, %320, %cst_88 [1] : vector<16x4xf32> to vector<16xf32>
    %322 = vector.shape_cast %321 : vector<16xf32> to vector<16x1xf32>
    %323 = math.log %322 : vector<16x1xf32>
    %324 = vector.broadcast %323 : vector<16x1xf32> to vector<16x4xf32>
    %325 = arith.subf %319, %324 : vector<16x4xf32>
    %c0_89 = arith.constant 0 : index
    %c0_90 = arith.constant 0 : index
    %326 = vector.load %arg10[%c0_89, %c0_90] : memref<16x4xf32, #tpu.memory_space<vmem>>, vector<16x4xf32>
    tpu.vector_store %arg10[%c0_89, %c0_90], %325 {strides = array<i32>} : memref<16x4xf32, #tpu.memory_space<vmem>>, vector<16x4xf32>,
    return
  }
}

</mosaic_0001>

<bundles_post_ra>
// kernel: tpu_custom_call.1
= control target key start
LH: loop header
LB: loop body
LE: loop exit
PB: predicated region body
PF: predicated region fallthrough
CT: control target
= control target key end

     0   :  { %vm47_vm0 = vcmask 130048   ;;  %vm71_vm1 = vcmask 64512   ;;  %s1136_s23 = smov 120   ;;  %s1137_s24 = smov 104   ;;  %s1600_s2 = inlined_call_operand.vmem [shape: f32[16,64], index: 2, kind: input, shape index: {}]   ;;  %s1601_s0 = inlined_call_operand.vmem [shape: f32[16,16], index: 0, kind: input, shape index: {}]   ;;  %s1602_s4 = inlined_call_operand.vmem [shape: f32[1,64], index: 4, kind: input, shape index: {}]   ;;  %s1603_s3 = inlined_call_operand.vmem [shape: f32[1,64], index: 3, kind: input, shape index: {}]   ;;  %s1604_s1 = inlined_call_operand.vmem [shape: bf16[16,16], index: 1, kind: input, shape index: {}]   ;;  %s1605_s5 = inlined_call_operand.vmem [shape: f32[1,64], index: 5, kind: input, shape index: {}]   ;;  %s1606_s8 = inlined_call_operand.vmem [shape: f32[1,4], index: 8, kind: input, shape index: {}]   ;;  %s1607_s6 = inlined_call_operand.vmem [shape: f32[64,4], index: 6, kind: input, shape index: {}]   ;;  %s1608_s7 = inlined_call_operand.vmem [shape: f32[1,4], index: 7, kind: input, shape index: {}]   ;;  %s1609_s9 = inlined_call_operand.vmem [shape: f32[1,4], index: 9, kind: input, shape index: {}]   ;;  %s1610_s10 = inlined_call_operand.vmem [shape: f32[16,4], index: 10, kind: output, shape index: {}]  }
   0x1   :  { %v40_v0 = vld [vmem:[%s1600_s2] sm:$0xff]  ;;  %v41_v1 = vld [vmem:[%s1600_s2 + $0x8] sm:$0xff]  ;;  %s1138_s25 = smov 96   ;;  %s1140_s26 = smov 80  }
   0x2   :  { %v36_v2 = vld [vmem:[%s1601_s0] sm:$0xff]  ;;  %v46_v3 = vpack.c.bf16 %v41_v1, %v40_v0  ;;  %v37_v4 = vld [vmem:[%s1601_s0 + $0x8] sm:$0xff]  ;;  %s1135_s0 = smov 112   ;;  %s1142_s29 = smov 8  }
   0x3   :  { %v45_v5 = vpack.c.bf16 %v37_v4, %v36_v2  ;;  %v1047_v6 = vld [vmem:[%s1602_s4] ss:$0 sm:$0xff]  ;;  %s1143_s30 = smov 24   ;;  %s1144_s11 = smov 16  }
   0x4   :  { %58 = vmatpush.bf16.msra.mxu0 %v46_v3  ;;  %v42_v15 = vld [vmem:[%s1603_s3] sm:$0x1]  ;;  %s1139_s3 = smov 88   ;;  %s1145_s12 = smov 40  }
   0x5   :  { %v1238_v16 = vpack.c.bf16 %v42_v15, %v42_v15  ;;  %v1030_v23 = vld [vmem:[%s1604_s1] sm:$0xff]   ;;  %s1141_s1 = smov 72   ;;  %s1146_s13 = smov 32  }
   0x6   :  { %v1265_v28 = vunpack.c.l.bf16 %v1030_v23  ;;  %v1269_v36 = vunpack.c.h.bf16 %v1030_v23  ;;  %s1147_s14 = smov 48   ;;  %s1148_s15 = smov 56  }
   0x7   :  { %1007 = vmatmul.msk.bf16.vlgmr.msra.gmra.mxu0 %vm47_vm0, %v45_v5 }
  0x84   :  { %v60_v7 = vpop.f32.mrf.mxu0 }
  0x85   :  { %v1220_v8 = vmul.f32 %v1047_v6, %v60_v7 }
  0x87   :  { %v72_v9 = vsel %vm71_vm1, %v1220_v8, 0.0 }
  0x88   :  { %73 = vadd.xlane.f32.xlu0 %v72_v9 }
  0x8c   :  { %v62_v10 = vpop.f32.mrf.mxu0 }
  0x8d   :  { %v1224_v11 = vpack.c.bf16 %v62_v10, %v60_v7  ;;  %v1226_v12 = vmul.f32 %v1047_v6, %v62_v10 }
  0x8f   :  { %256 = vrot.lane.b32.xlu2 %v1224_v11, %s1135_s0  ;;  %144 = vmatpush.bf16.msra.mxu2 %v1224_v11  ;;  %v75_v13 = vsel %vm71_vm1, %v1226_v12, 0.0  ;;  %v83_v14 = vsel %vm71_vm1, %v1224_v11, 0 }
  0x90   :  { %76 = vadd.xlane.f32.xlu0 %v75_v13  ;;  %92 = vmatpush.bf16.xpose.msra.mxu1 %v83_v14 }
  0x97   :  { %1008 = vmatmul.msk.bf16.vlgmr.msra.gmra.mxu1 %vm71_vm1, %v1238_v16  ;;  %254 = vrot.lane.b32.xlu2 %v1238_v16, %s1135_s0 }
  0xa4   :  { %169 = vrot.lane.b32.xlu0 %v1224_v11, %s1136_s23 }
  0xac   :  { %343 = vrot.lane.b32.xlu0 %v1224_v11, %s1137_s24 }
  0xb4   :  { %430 = vrot.lane.b32.xlu0 %v1224_v11, %s1138_s25 }
  0xbc   :  { %515 = vrot.lane.b32.xlu0 %v1238_v16, %s1139_s3 }
  0xc4   :  { %602 = vrot.lane.b32.xlu0 %v1238_v16, %s1140_s26 }
  0xcc   :  { %155 = vrot.lane.b32.xlu0 %v1226_v12, %s1136_s23 }
  0xd4   :  { %329 = vrot.lane.b32.xlu0 %v1220_v8, %s1137_s24 }
  0xdc   :  { %418 = vrot.lane.b32.xlu0 %v1226_v12, %s1138_s25 }
  0xe9   :  { %v257_v17 = vpop.permute.xlu2 %256 }
  0xea   :  { %322 = vmatpush.bf16.msrb.mxu1 %v257_v17  ;;  %v262_v18 = vsel %vm71_vm1, %v257_v17, 0 }
  0xeb   :  { %271 = vmatpush.bf16.xpose.msrb.mxu2 %v262_v18 }
  0xf1   :  { %v255_v63 = vpop.permute.xlu2 %254 }
  0xfb   :  { %v74_v19 = vpop.xlane.xlu0 %73 }
 0x103   :  { %v77_v20 = vpop.xlane.xlu0 %76 }
 0x114   :  { %v94_v21 = vpop.f32.mrf.mxu1 }
 0x115   :  { %v98_v22 = vperm.slane %v94_v21, 0 }
 0x116   :  { %v170_v24 = vpop.permute.xlu0 %169 }
 0x117   :  { %v99_v25 = vadd.f32 %v98_v22, %v74_v19  ;;  %v100_v26 = vadd.f32 %v98_v22, %v77_v20  ;;  %235 = vmatpush.bf16.msrb.mxu0 %v170_v24  ;;  %v175_v27 = vsel %vm71_vm1, %v170_v24, 0 }
 0x118   :  { %184 = vmatpush.bf16.xpose.msra.mxu3 %v175_v27 }
 0x119   :  { %v103_v29 = vmul.f32 0.2, %v99_v25  ;;  %vm101_vm2 = vcmp.gt.f32.partialorder %v99_v25, 0.0  ;;  %v104_v30 = vmul.f32 0.2, %v100_v26  ;;  %vm102_vm3 = vcmp.gt.f32.partialorder %v100_v26, 0.0 }
 0x11b   :  { %v105_v31 = vsel %vm101_vm2, %v99_v25, %v103_v29  ;;  %v106_v38 = vsel %vm102_vm3, %v100_v26, %v104_v30 }
 0x11c   :  { %v96_v32 = vpop.f32.mrf.mxu1  ;;  %v109_v33 = vadd.f32 %v1265_v28, %v105_v31  ;;  %v110_v39 = vadd.f32 %v1269_v36, %v106_v38 }
 0x11e   :  { %v344_v34 = vpop.permute.xlu0 %343  ;;  %v111_v35 = vsel %vm47_vm0, %v109_v33, -inf  ;;  %v114_v41 = vsel %vm47_vm0, %v110_v39, -inf }
 0x11f   :  { %409 = vmatpush.bf16.msra.mxu0 %v344_v34  ;;  %112 = vmax.xlane.f32.xlu1 %v111_v35  ;;  %v349_v37 = vsel %vm71_vm1, %v344_v34, 0 }
 0x120   :  { %358 = vmatpush.bf16.xpose.msrb.mxu3 %v349_v37 }
 0x126   :  { %v1273_v40 = vpop.permute.xlu0 %430 }
 0x127   :  { %496 = vmatpush.bf16.msra.mxu1 %v1273_v40  ;;  %115 = vmax.xlane.f32.xlu1 %v114_v41  ;;  %v436_v15 = vsel %vm71_vm1, %v1273_v40, 0 }
 0x12e   :  { %v516_v60 = vpop.permute.xlu0 %515 }
 0x136   :  { %v1321_v61 = vpop.permute.xlu0 %602 }
 0x13e   :  { %v156_v62 = vpop.permute.xlu0 %155 }
 0x13f   :  { %v162_v0 = vsel %vm71_vm1, %v156_v62, 0.0 }
 0x140   :  { %166 = vrot.lane.b32.xlu1 %v1238_v16, %s1136_s23 }
 0x146   :  { %v330_v2 = vpop.permute.xlu0 %329 }
 0x147   :  { %v335_v3 = vsel %vm71_vm1, %v330_v2, 0.0 }
 0x148   :  { %341 = vrot.lane.b32.xlu1 %v1238_v16, %s1137_s24 }
 0x14e   :  { %v419_v24 = vpop.permute.xlu0 %418 }
 0x150   :  { %428 = vrot.lane.b32.xlu1 %v1238_v16, %s1138_s25 }
 0x158   :  { %691 = vrot.lane.b32.xlu1 %v1224_v11, %s1141_s1 }
 0x160   :  { %153 = vrot.lane.b32.xlu1 %v1220_v8, %s1136_s23 }
 0x168   :  { %244 = vrot.lane.b32.xlu1 %v1226_v12, %s1135_s0 }
 0x170   :  { %416 = vrot.lane.b32.xlu1 %v1220_v8, %s1138_s25 }
 0x178   :  { %505 = vrot.lane.b32.xlu1 %v1226_v12, %s1139_s3 }
 0x180   :  { %590 = vrot.lane.b32.xlu1 %v1220_v8, %s1140_s26 }
 0x188   :  { %592 = vrot.lane.b32.xlu1 %v1226_v12, %s1140_s26 }
 0x190   :  { %677 = vrot.lane.b32.xlu1 %v1220_v8, %s1141_s1 }
 0x192   :  { %v113_v42 = vpop.xlane.xlu1 %112 }
 0x193   :  { %v117_v43 = vsub.f32 %v109_v33, %v113_v42  ;;  %v425_v33 = vsel %vm71_vm1, %v419_v24, 0.0 }
 0x195   :  { %v119_v44 = vmul.f32 1.442695, %v117_v43 }
 0x197   :  { %1051 = vpow2.f32 %v119_v44 }
 0x198   :  { %679 = vrot.lane.b32.xlu1 %v1226_v12, %s1141_s1 }
 0x19a   :  { %v116_v45 = vpop.xlane.xlu1 %115 }
 0x19b   :  { %v118_v46 = vsub.f32 %v110_v39, %v116_v45 }
 0x19d   :  { %v1052_v47 = vpop.eup %1051  ;;  %v121_v48 = vmul.f32 1.442695, %v118_v46 }
 0x19e   :  { %v123_v49 = vsel %vm47_vm0, %v1052_v47, 0.0 }
 0x19f   :  { %1053 = vpow2.f32 %v121_v48  ;;  %124 = vadd.xlane.f32.xlu2 %v123_v49 }
 0x1a5   :  { %v1054_v50 = vpop.eup %1053 }
 0x1a6   :  { %v126_v51 = vsel %vm47_vm0, %v1054_v50, 0.0 }
 0x1a7   :  { %127 = vadd.xlane.f32.xlu2 %v126_v51 }
 0x1b2   :  { %v167_v52 = vpop.permute.xlu1 %166 }
 0x1b3   :  { %1010 = vmatmul.msk.bf16.vlgmr.msra.gmra.mxu3 %vm71_vm1, %v167_v52 }
 0x1ba   :  { %v342_v53 = vpop.permute.xlu1 %341 }
 0x1bf   :  { %517 = vrot.lane.b32.xlu2 %v1224_v11, %s1139_s3 }
 0x1c2   :  { %v429_v54 = vpop.permute.xlu1 %428 }
 0x1c3   :  { %1014 = vmatmul.msk.bf16.vlgmr.msrb.gmra.mxu3 %vm71_vm1, %v342_v53 }
 0x1c7   :  { %604 = vrot.lane.b32.xlu2 %v1224_v11, %s1140_s26 }
 0x1ca   :  { %v1309_v55 = vpop.permute.xlu1 %691 }
 0x1cb   :  { %v697_v13 = vsel %vm71_vm1, %v1309_v55, 0 }
 0x1cf   :  { %689 = vrot.lane.b32.xlu2 %v1238_v16, %s1141_s1 }
 0x1d2   :  { %v154_v56 = vpop.permute.xlu1 %153 }
 0x1d3   :  { %v159_v57 = vsel %vm71_vm1, %v154_v56, 0.0 }
 0x1d4   :  { %160 = vadd.xlane.f32.xlu0 %v159_v57 }
 0x1d7   :  { %242 = vrot.lane.b32.xlu2 %v1220_v8, %s1135_s0 }
 0x1da   :  { %v245_v58 = vpop.permute.xlu1 %244 }
 0x1db   :  { %v251_v59 = vsel %vm71_vm1, %v245_v58, 0.0 }
 0x1dc   :  { %252 = vadd.xlane.f32.xlu0 %v251_v59 }
 0x1df   :  { %331 = vrot.lane.b32.xlu2 %v1226_v12, %s1137_s24 }
 0x1e2   :  { %v417_v5 = vpop.permute.xlu1 %416 }
 0x1e3   :  { %v422_v7 = vsel %vm71_vm1, %v417_v5, 0.0 }
 0x1e7   :  { %503 = vrot.lane.b32.xlu2 %v1220_v8, %s1139_s3 }
 0x1ea   :  { %v506_v20 = vpop.permute.xlu1 %505 }
 0x1eb   :  { %v512_v40 = vsel %vm71_vm1, %v506_v20, 0.0 }
 0x1f2   :  { %v591_v25 = vpop.permute.xlu1 %590 }
 0x1f3   :  { %v596_v41 = vsel %vm71_vm1, %v591_v25, 0.0 }
 0x1fa   :  { %v593_v35 = vpop.permute.xlu1 %592 }
 0x1fb   :  { %v599_v46 = vsel %vm71_vm1, %v593_v35, 0.0 }
 0x202   :  { %v678_v43 = vpop.permute.xlu1 %677 }
 0x203   :  { %v683_v48 = vsel %vm71_vm1, %v678_v43, 0.0 }
 0x210   :  { %163 = vadd.xlane.f32.xlu2 %v162_v0 }
 0x212   :  { %v125_v1 = vpop.xlane.xlu2 %124 }
 0x213   :  { %1055 = vrcp.f32 %v125_v1 }
 0x218   :  { %336 = vadd.xlane.f32.xlu2 %v335_v3 }
 0x219   :  { %v1056_v6 = vpop.eup %1055 }
 0x21a   :  { %v128_v4 = vpop.xlane.xlu2 %127  ;;  %v131_v10 = vmul.f32 %v1056_v6, %v1052_v47  ;;  %v680_v47 = vpop.permute.xlu1 %679 }
 0x21b   :  { %1057 = vrcp.f32 %v128_v4  ;;  %v686_v49 = vsel %vm71_vm1, %v680_v47, 0.0 }
 0x220   :  { %423 = vadd.xlane.f32.xlu2 %v422_v7 }
 0x221   :  { %v1058_v8 = vpop.eup %1057 }
 0x222   :  { %v1326_v9 = vpop.permute.xlu2 %517  ;;  %v132_v11 = vmul.f32 %v1058_v8, %v1054_v50 }
 0x223   :  { %v523_v12 = vsel %vm71_vm1, %v1326_v9, 0 }
 0x224   :  { %532 = vmatpush.bf16.xpose.msra.mxu3 %v523_v12  ;;  %v133_v14 = vpack.c.bf16 %v132_v11, %v131_v10 }
 0x226   :  { %1009 = vmatmul.msk.bf16.vlgmr.msra.gmra.mxu2 %vm47_vm0, %v133_v14 }
 0x227   :  { %445 = vmatpush.bf16.xpose.msra.mxu2 %v436_v15 }
 0x22a   :  { %v1335_v16 = vpop.permute.xlu2 %604 }
 0x22b   :  { %1018 = vmatmul.msk.bf16.vlgmr.msra.gmra.mxu3 %vm71_vm1, %v516_v60  ;;  %v610_v18 = vsel %vm71_vm1, %v1335_v16, 0 }
 0x22c   :  { %706 = vmatpush.bf16.xpose.msrb.mxu3 %v697_v13 }
 0x232   :  { %v690_v17 = vpop.permute.xlu2 %689 }
 0x236   :  { %1012 = vmatmul.msk.bf16.vlgmr.msrb.gmra.mxu2 %vm71_vm1, %v255_v63  ;;  %v186_v19 = vpop.f32.mrf.mxu3 }
 0x237   :  { %619 = vmatpush.bf16.xpose.msrb.mxu2 %v610_v18  ;;  %v190_v30 = vperm.slane %v186_v19, 0 }
 0x23a   :  { %v243_v21 = vpop.permute.xlu2 %242 }
 0x23b   :  { %1022 = vmatmul.msk.bf16.vlgmr.msrb.gmra.mxu3 %vm71_vm1, %v690_v17  ;;  %v248_v22 = vsel %vm71_vm1, %v243_v21, 0.0 }
 0x23c   :  { %249 = vadd.xlane.f32.xlu1 %v248_v22 }
 0x23e   :  { %v188_v23 = vpop.f32.mrf.mxu3 }
 0x242   :  { %v332_v26 = vpop.permute.xlu2 %331 }
 0x243   :  { %v338_v27 = vsel %vm71_vm1, %v332_v26, 0.0 }
 0x244   :  { %339 = vadd.xlane.f32.xlu0 %v338_v27 }
 0x246   :  { %1016 = vmatmul.msk.bf16.vlgmr.msra.gmra.mxu2 %vm71_vm1, %v429_v54  ;;  %v360_v29 = vpop.f32.mrf.mxu3 }
 0x247   :  { %v161_v31 = vpop.xlane.xlu0 %160  ;;  %v364_v56 = vperm.slane %v360_v29, 0 }
 0x248   :  { %v191_v37 = vadd.f32 %v190_v30, %v161_v31 }
 0x24a   :  { %v504_v32 = vpop.permute.xlu2 %503  ;;  %v195_v39 = vmul.f32 0.2, %v191_v37  ;;  %vm193_vm4 = vcmp.gt.f32.partialorder %v191_v37, 0.0 }
 0x24b   :  { %v509_v34 = vsel %vm71_vm1, %v504_v32, 0.0 }
 0x24c   :  { %426 = vadd.xlane.f32.xlu0 %v425_v33  ;;  %510 = vadd.xlane.f32.xlu2 %v509_v34  ;;  %v197_v42 = vsel %vm193_vm4, %v191_v37, %v195_v39  ;;  %vm824_vm4 = vcmask 195584  }
 0x24d   :  { %v1352_v44 = vadd.f32 %v1265_v28, %v197_v42 }
 0x24e   :  { %v362_v38 = vpop.f32.mrf.mxu3 }
 0x24f   :  { %v201_v45 = vsel %vm47_vm0, %v1352_v44, -inf  ;;  %v253_v2 = vpop.xlane.xlu0 %252 }
 0x254   :  { %513 = vadd.xlane.f32.xlu0 %v512_v40  ;;  %597 = vadd.xlane.f32.xlu2 %v596_v41 }
 0x256   :  { %1020 = vmatmul.msk.bf16.vlgmr.msrb.gmra.mxu2 %vm71_vm1, %v1321_v61 }
 0x25c   :  { %202 = vmax.xlane.f32.xlu2 %v201_v45  ;;  %600 = vadd.xlane.f32.xlu0 %v599_v46 }
 0x264   :  { %684 = vadd.xlane.f32.xlu0 %v683_v48  ;;  %687 = vadd.xlane.f32.xlu2 %v686_v49 }
 0x283   :  { %v164_v50 = vpop.xlane.xlu2 %163 }
 0x284   :  { %v192_v51 = vadd.f32 %v190_v30, %v164_v50 }
 0x286   :  { %vm194_vm5 = vcmp.gt.f32.partialorder %v192_v51, 0.0  ;;  %v196_v52 = vmul.f32 0.2, %v192_v51 }
 0x288   :  { %v198_v53 = vsel %vm194_vm5, %v192_v51, %v196_v52  ;;  %vm827_vm5 = vcmask 261120  }
 0x289   :  { %v1360_v54 = vadd.f32 %v1269_v36, %v198_v53 }
 0x28b   :  { %v337_v57 = vpop.xlane.xlu2 %336  ;;  %v204_v58 = vsel %vm47_vm0, %v1360_v54, -inf }
 0x28c   :  { %v365_v59 = vadd.f32 %v364_v56, %v337_v57  ;;  %205 = vmax.xlane.f32.xlu1 %v204_v58 }
 0x28e   :  { %vm367_vm6 = vcmp.gt.f32.partialorder %v365_v59, 0.0  ;;  %v369_v60 = vmul.f32 0.2, %v365_v59 }
 0x290   :  { %v371_v61 = vsel %vm367_vm6, %v365_v59, %v369_v60  ;;  %vm830_vm6 = vcmask 326656  }
 0x291   :  { %v1365_v62 = vadd.f32 %v1265_v28, %v371_v61 }
 0x293   :  { %v375_v63 = vsel %vm47_vm0, %v1365_v62, -inf  ;;  %v424_v5 = vpop.xlane.xlu2 %423 }
 0x294   :  { %376 = vmax.xlane.f32.xlu2 %v375_v63 }
 0x2a9   :  { %v1369_v0 = vpop.f32.mrf.mxu2 }
 0x2ae   :  { %v534_v1 = vpop.f32.mrf.mxu3 }
 0x2af   :  { %v250_v10 = vpop.xlane.xlu1 %249  ;;  %v538_v26 = vperm.slane %v534_v1, 0 }
 0x2b1   :  { %v1371_v3 = vpop.f32.mrf.mxu2 }
 0x2b6   :  { %v536_v4 = vpop.f32.mrf.mxu3 }
 0x2b7   :  { %v340_v6 = vpop.xlane.xlu0 %339 }
 0x2b8   :  { %v366_v11 = vadd.f32 %v364_v56, %v340_v6 }
 0x2b9   :  { %v273_v7 = vpop.f32.mrf.mxu2 }
 0x2ba   :  { %v277_v8 = vperm.slane %v273_v7, 0  ;;  %v370_v20 = vmul.f32 0.2, %v366_v11  ;;  %vm368_vm9 = vcmp.gt.f32.partialorder %v366_v11, 0.0 }
 0x2bc   :  { %v278_v12 = vadd.f32 %v277_v8, %v250_v10  ;;  %v279_v13 = vadd.f32 %v277_v8, %v253_v2  ;;  %v372_v30 = vsel %vm368_vm9, %v366_v11, %v370_v20 }
 0x2bd   :  { %v1386_v35 = vadd.f32 %v1269_v36, %v372_v30 }
 0x2be   :  { %v282_v14 = vmul.f32 0.2, %v278_v12  ;;  %v283_v15 = vmul.f32 0.2, %v279_v13  ;;  %v1373_v17 = vpop.f32.mrf.mxu3  ;;  %vm281_vm7 = vcmp.gt.f32.partialorder %v279_v13, 0.0  ;;  %vm280_vm8 = vcmp.gt.f32.partialorder %v278_v12, 0.0 }
 0x2bf   :  { %v427_v18 = vpop.xlane.xlu0 %426  ;;  %v511_v19 = vpop.xlane.xlu2 %510  ;;  %v378_v40 = vsel %vm47_vm0, %v1386_v35, -inf  ;;  %v712_v1 = vperm.slane %v1373_v17, 0 }
 0x2c0   :  { %v285_v21 = vsel %vm281_vm7, %v279_v13, %v283_v15  ;;  %v284_v22 = vsel %vm280_vm8, %v278_v12, %v282_v14  ;;  %v539_v31 = vadd.f32 %v538_v26, %v511_v19  ;;  %vm833_vm7 = vcmask 392192  }
 0x2c1   :  { %v275_v23 = vpop.f32.mrf.mxu2  ;;  %v1376_v24 = vadd.f32 %v1269_v36, %v285_v21  ;;  %v1379_v25 = vadd.f32 %v1265_v28, %v284_v22  ;;  %vm836_vm8 = vcmask 457728  }
 0x2c2   :  { %v543_v37 = vmul.f32 0.2, %v539_v31  ;;  %vm541_vm10 = vcmp.gt.f32.partialorder %v539_v31, 0.0 }
 0x2c3   :  { %v291_v27 = vsel %vm47_vm0, %v1376_v24, -inf  ;;  %v288_v29 = vsel %vm47_vm0, %v1379_v25, -inf }
 0x2c4   :  { %292 = vmax.xlane.f32.xlu0 %v291_v27  ;;  %289 = vmax.xlane.f32.xlu1 %v288_v29  ;;  %v545_v45 = vsel %vm541_vm10, %v539_v31, %v543_v37  ;;  %vm872_vm10 = vcmask 523264  }
 0x2c5   :  { %v1391_v53 = vadd.f32 %v1265_v28, %v545_v45 }
 0x2c6   :  { %v710_v32 = vpop.f32.mrf.mxu3 }
 0x2c7   :  { %v514_v33 = vpop.xlane.xlu0 %513  ;;  %v598_v34 = vpop.xlane.xlu2 %597  ;;  %v549_v61 = vsel %vm47_vm0, %v1391_v53, -inf }
 0x2c8   :  { %v540_v41 = vadd.f32 %v538_v26, %v514_v33 }
 0x2c9   :  { %v447_v38 = vpop.f32.mrf.mxu2 }
 0x2ca   :  { %v451_v39 = vperm.slane %v447_v38, 0  ;;  %v544_v49 = vmul.f32 0.2, %v540_v41  ;;  %vm542_vm13 = vcmp.gt.f32.partialorder %v540_v41, 0.0 }
 0x2cc   :  { %v452_v42 = vadd.f32 %v451_v39, %v424_v5  ;;  %v453_v43 = vadd.f32 %v451_v39, %v427_v18  ;;  %379 = vmax.xlane.f32.xlu1 %v378_v40  ;;  %v546_v63 = vsel %vm542_vm13, %v540_v41, %v544_v49 }
 0x2cd   :  { %v1407_v4 = vadd.f32 %v1269_v36, %v546_v63 }
 0x2ce   :  { %v456_v46 = vmul.f32 0.2, %v452_v42  ;;  %v457_v47 = vmul.f32 0.2, %v453_v43  ;;  %vm454_vm11 = vcmp.gt.f32.partialorder %v452_v42, 0.0  ;;  %vm455_vm12 = vcmp.gt.f32.partialorder %v453_v43, 0.0 }
 0x2cf   :  { %v601_v48 = vpop.xlane.xlu0 %600  ;;  %v203_v50 = vpop.xlane.xlu2 %202  ;;  %v552_v12 = vsel %vm47_vm0, %v1407_v4, -inf }
 0x2d0   :  { %v458_v51 = vsel %vm454_vm11, %v452_v42, %v456_v46  ;;  %v459_v52 = vsel %vm455_vm12, %v453_v43, %v457_v47  ;;  %v207_v7 = vsub.f32 %v1352_v44, %v203_v50  ;;  %vm896_vm11 = vcmask 31744  }
 0x2d1   :  { %v449_v56 = vpop.f32.mrf.mxu2  ;;  %v1394_v57 = vadd.f32 %v1265_v28, %v458_v51  ;;  %v1397_v58 = vadd.f32 %v1269_v36, %v459_v52 }
 0x2d2   :  { %v209_v18 = vmul.f32 1.442695, %v207_v7 }
 0x2d3   :  { %v462_v59 = vsel %vm47_vm0, %v1394_v57, -inf  ;;  %v465_v60 = vsel %vm47_vm0, %v1397_v58, -inf }
 0x2d4   :  { %463 = vmax.xlane.f32.xlu0 %v462_v59  ;;  %466 = vmax.xlane.f32.xlu2 %v465_v60  ;;  %1059 = vpow2.f32 %v209_v18 }
 0x2d5   :  { %550 = vmax.xlane.f32.xlu1 %v549_v61 }
 0x2d7   :  { %v685_v2 = vpop.xlane.xlu0 %684  ;;  %v688_v10 = vpop.xlane.xlu2 %687 }
 0x2d8   :  { %v713_v5 = vadd.f32 %v712_v1, %v685_v2  ;;  %v714_v14 = vadd.f32 %v712_v1, %v688_v10 }
 0x2d9   :  { %v621_v6 = vpop.f32.mrf.mxu2 }
 0x2da   :  { %vm715_vm14 = vcmp.gt.f32.partialorder %v713_v5, 0.0  ;;  %v717_v8 = vmul.f32 0.2, %v713_v5  ;;  %v625_v11 = vperm.slane %v621_v6, 0  ;;  %v718_v44 = vmul.f32 0.2, %v714_v14  ;;  %v1430_v37 = vpop.eup %1059 }
 0x2db   :  { %vm716_vm3 = vcmp.gt.f32.partialorder %v714_v14, 0.0  ;;  %v213_v39 = vsel %vm47_vm0, %v1430_v37, 0.0 }
 0x2dc   :  { %553 = vmax.xlane.f32.xlu0 %v552_v12  ;;  %v719_v13 = vsel %vm715_vm14, %v713_v5, %v717_v8  ;;  %v626_v15 = vadd.f32 %v625_v11, %v598_v34  ;;  %v627_v17 = vadd.f32 %v625_v11, %v601_v48  ;;  %v720_v33 = vsel %vm716_vm3, %v714_v14, %v718_v44 }
 0x2dd   :  { %v1413_v21 = vadd.f32 %v1265_v28, %v719_v13  ;;  %v1428_v34 = vadd.f32 %v1269_v36, %v720_v33 }
 0x2de   :  { %v630_v19 = vmul.f32 0.2, %v626_v15  ;;  %v631_v20 = vmul.f32 0.2, %v627_v17  ;;  %vm628_vm15 = vcmp.gt.f32.partialorder %v626_v15, 0.0  ;;  %vm629_vm2 = vcmp.gt.f32.partialorder %v627_v17, 0.0 }
 0x2df   :  { %v723_v30 = vsel %vm47_vm0, %v1413_v21, -inf  ;;  %v726_v38 = vsel %vm47_vm0, %v1428_v34, -inf }
 0x2e0   :  { %v632_v23 = vsel %vm628_vm15, %v626_v15, %v630_v19  ;;  %v633_v26 = vsel %vm629_vm2, %v627_v17, %v631_v20 }
 0x2e1   :  { %v623_v22 = vpop.f32.mrf.mxu2  ;;  %v1416_v27 = vadd.f32 %v1265_v28, %v632_v23  ;;  %v1419_v29 = vadd.f32 %v1269_v36, %v633_v26 }
 0x2e3   :  { %v636_v31 = vsel %vm47_vm0, %v1416_v27, -inf  ;;  %v639_v32 = vsel %vm47_vm0, %v1419_v29, -inf }
 0x2e4   :  { %724 = vmax.xlane.f32.xlu0 %v723_v30  ;;  %637 = vmax.xlane.f32.xlu2 %v636_v31 }
 0x2e5   :  { %640 = vmax.xlane.f32.xlu1 %v639_v32 }
 0x2ec   :  { %727 = vmax.xlane.f32.xlu2 %v726_v38 }
 0x2ed   :  { %214 = vadd.xlane.f32.xlu1 %v213_v39 }
 0x2ff   :  { %v206_v40 = vpop.xlane.xlu1 %205 }
 0x300   :  { %v208_v41 = vsub.f32 %v1360_v54, %v206_v40 }
 0x302   :  { %v211_v42 = vmul.f32 1.442695, %v208_v41 }
 0x304   :  { %1061 = vpow2.f32 %v211_v42 }
 0x307   :  { %v377_v43 = vpop.xlane.xlu2 %376 }
 0x308   :  { %v381_v45 = vsub.f32 %v1365_v62, %v377_v43 }
 0x30a   :  { %v1438_v46 = vpop.eup %1061  ;;  %v383_v47 = vmul.f32 1.442695, %v381_v45 }
 0x30b   :  { %v216_v48 = vsel %vm47_vm0, %v1438_v46, 0.0 }
 0x30c   :  { %1063 = vpow2.f32 %v383_v47  ;;  %217 = vadd.xlane.f32.xlu0 %v216_v48 }
 0x312   :  { %v1442_v49 = vpop.eup %1063 }
 0x313   :  { %v387_v50 = vsel %vm47_vm0, %v1442_v49, 0.0 }
 0x314   :  { %388 = vadd.xlane.f32.xlu0 %v387_v50 }
 0x337   :  { %v293_v54 = vpop.xlane.xlu0 %292  ;;  %v290_v51 = vpop.xlane.xlu1 %289 }
 0x338   :  { %v295_v52 = vsub.f32 %v1376_v24, %v293_v54  ;;  %v294_v62 = vsub.f32 %v1379_v25, %v290_v51 }
 0x33a   :  { %v298_v56 = vmul.f32 1.442695, %v295_v52  ;;  %v296_v59 = vmul.f32 1.442695, %v294_v62 }
 0x33c   :  { %1065 = vpow2.f32 %v298_v56 }
 0x33d   :  { %1067 = vpow2.f32 %v296_v59 }
 0x33f   :  { %v380_v60 = vpop.xlane.xlu1 %379 }
 0x340   :  { %v382_v61 = vsub.f32 %v1386_v35, %v380_v60 }
 0x342   :  { %v1449_v63 = vpop.eup %1065  ;;  %v385_v1 = vmul.f32 1.442695, %v382_v61 }
 0x343   :  { %v1451_v2 = vpop.eup %1067  ;;  %v303_v5 = vsel %vm47_vm0, %v1449_v63, 0.0 }
 0x344   :  { %1069 = vpow2.f32 %v385_v1  ;;  %304 = vadd.xlane.f32.xlu1 %v303_v5  ;;  %v300_v24 = vsel %vm47_vm0, %v1451_v2, 0.0 }
 0x345   :  { %301 = vadd.xlane.f32.xlu2 %v300_v24 }
 0x347   :  { %v464_v25 = vpop.xlane.xlu0 %463  ;;  %v467_v6 = vpop.xlane.xlu2 %466 }
 0x348   :  { %v468_v7 = vsub.f32 %v1394_v57, %v464_v25  ;;  %v469_v35 = vsub.f32 %v1397_v58, %v467_v6  ;;  %v551_v8 = vpop.xlane.xlu1 %550 }
 0x349   :  { %v555_v10 = vsub.f32 %v1391_v53, %v551_v8 }
 0x34a   :  { %v1460_v11 = vpop.eup %1069  ;;  %v470_v12 = vmul.f32 1.442695, %v468_v7  ;;  %v472_v13 = vmul.f32 1.442695, %v469_v35 }
 0x34b   :  { %v557_v14 = vmul.f32 1.442695, %v555_v10  ;;  %v390_v15 = vsel %vm47_vm0, %v1460_v11, 0.0 }
 0x34c   :  { %1071 = vpow2.f32 %v470_v12 }
 0x34d   :  { %1073 = vpow2.f32 %v472_v13  ;;  %391 = vadd.xlane.f32.xlu2 %v390_v15 }
 0x34e   :  { %1075 = vpow2.f32 %v557_v14 }
 0x34f   :  { %v554_v17 = vpop.xlane.xlu0 %553 }
 0x350   :  { %v556_v57 = vsub.f32 %v1407_v4, %v554_v17 }
 0x352   :  { %v1465_v18 = vpop.eup %1071  ;;  %v559_v58 = vmul.f32 1.442695, %v556_v57 }
 0x353   :  { %v1467_v19 = vpop.eup %1073  ;;  %v474_v53 = vsel %vm47_vm0, %v1465_v18, 0.0 }
 0x354   :  { %v1471_v20 = vpop.eup %1075  ;;  %1077 = vpow2.f32 %v559_v58  ;;  %475 = vadd.xlane.f32.xlu1 %v474_v53  ;;  %v477_v44 = vsel %vm47_vm0, %v1467_v19, 0.0 }
 0x355   :  { %478 = vadd.xlane.f32.xlu0 %v477_v44  ;;  %v561_v22 = vsel %vm47_vm0, %v1471_v20, 0.0 }
 0x356   :  { %562 = vadd.xlane.f32.xlu2 %v561_v22 }
 0x357   :  { %v725_v4 = vpop.xlane.xlu0 %724  ;;  %v638_v26 = vpop.xlane.xlu2 %637 }
 0x358   :  { %v729_v23 = vsub.f32 %v1413_v21, %v725_v4  ;;  %v641_v30 = vpop.xlane.xlu1 %640  ;;  %v642_v31 = vsub.f32 %v1416_v27, %v638_v26 }
 0x359   :  { %v643_v32 = vsub.f32 %v1419_v29, %v641_v30 }
 0x35a   :  { %v1480_v33 = vpop.eup %1077  ;;  %v731_v38 = vmul.f32 1.442695, %v729_v23  ;;  %v644_v39 = vmul.f32 1.442695, %v642_v31 }
 0x35b   :  { %v646_v40 = vmul.f32 1.442695, %v643_v32  ;;  %v564_v41 = vsel %vm47_vm0, %v1480_v33, 0.0 }
 0x35c   :  { %1079 = vpow2.f32 %v731_v38  ;;  %565 = vadd.xlane.f32.xlu1 %v564_v41 }
 0x35d   :  { %1081 = vpow2.f32 %v644_v39 }
 0x35e   :  { %1083 = vpow2.f32 %v646_v40 }
 0x35f   :  { %v728_v42 = vpop.xlane.xlu2 %727 }
 0x360   :  { %v730_v21 = vsub.f32 %v1428_v34, %v728_v42  ;;  %v215_v51 = vpop.xlane.xlu1 %214 }
 0x362   :  { %v1485_v43 = vpop.eup %1079  ;;  %v733_v29 = vmul.f32 1.442695, %v730_v21 }
 0x363   :  { %v1487_v27 = vpop.eup %1081  ;;  %v735_v45 = vsel %vm47_vm0, %v1485_v43, 0.0 }
 0x364   :  { %v1491_v47 = vpop.eup %1083  ;;  %736 = vadd.xlane.f32.xlu1 %v735_v45  ;;  %v648_v48 = vsel %vm47_vm0, %v1487_v27, 0.0  ;;  %1085 = vpow2.f32 %v733_v29 }
 0x365   :  { %649 = vadd.xlane.f32.xlu0 %v648_v48  ;;  %v651_v50 = vsel %vm47_vm0, %v1491_v47, 0.0  ;;  %1087 = vrcp.f32 %v215_v51 }
 0x366   :  { %652 = vadd.xlane.f32.xlu2 %v651_v50 }
 0x36a   :  { %v1497_v34 = vpop.eup %1085 }
 0x36b   :  { %v738_v54 = vsel %vm47_vm0, %v1497_v34, 0.0  ;;  %v1088_v62 = vpop.eup %1087 }
 0x36c   :  { %v221_v59 = vmul.f32 %v1088_v62, %v1430_v37 }
 0x36d   :  { %739 = vadd.xlane.f32.xlu0 %v738_v54 }
 0x37f   :  { %v218_v52 = vpop.xlane.xlu0 %217 }
 0x380   :  { %1089 = vrcp.f32 %v218_v52 }
 0x386   :  { %v1090_v56 = vpop.eup %1089 }
 0x387   :  { %v222_v60 = vmul.f32 %v1090_v56, %v1438_v46  ;;  %v389_v24 = vpop.xlane.xlu0 %388 }
 0x389   :  { %v223_v61 = vpack.c.bf16 %v222_v60, %v221_v59 }
 0x38b   :  { %1011 = vmatmul.msk.bf16.vlgmr.msrb.gmra.mxu0 %vm47_vm0, %v223_v61 }
 0x38c   :  { %583 = vmatpush.bf16.msrb.mxu0 %v1326_v9 }
 0x3b7   :  { %v305_v1 = vpop.xlane.xlu1 %304 }
 0x3b8   :  { %v302_v5 = vpop.xlane.xlu2 %301  ;;  %1091 = vrcp.f32 %v305_v1 }
 0x3b9   :  { %1093 = vrcp.f32 %v302_v5 }
 0x3ba   :  { %1095 = vrcp.f32 %v389_v24  ;;  %v862_v24 = vld [vmem:[%s1607_s6 + $0x30] sm:$0xff] }
 0x3be   :  { %v1092_v25 = vpop.eup %1091 }
 0x3bf   :  { %v1094_v6 = vpop.eup %1093  ;;  %v309_v7 = vmul.f32 %v1092_v25, %v1449_v63  ;;  %v863_v25 = vld [vmem:[%s1607_s6 + $0x38] sm:$0xff] }
 0x3c0   :  { %v308_v35 = vmul.f32 %v1094_v6, %v1451_v2  ;;  %v392_v37 = vpop.xlane.xlu2 %391  ;;  %v1096_v8 = vpop.eup %1095 }
 0x3c1   :  { %1097 = vrcp.f32 %v392_v37  ;;  %v395_v12 = vmul.f32 %v1096_v8, %v1442_v49  ;;  %v861_v37 = vld [vmem:[%s1607_s6 + $0x28] sm:$0xff] }
 0x3c2   :  { %v310_v46 = vpack.c.bf16 %v309_v7, %v308_v35  ;;  %v871_v7 = vpack.c.bf16 %v863_v25, %v862_v24  ;;  %v860_v35 = vld [vmem:[%s1607_s6 + $0x20] sm:$0xff] }
 0x3c3   :  { %v870_v8 = vpack.c.bf16 %v861_v37, %v860_v35 }
 0x3c4   :  { %1013 = vmatmul.msk.bf16.vlgmr.msrb.gmra.mxu1 %vm47_vm0, %v310_v46  ;;  %880 = vmatpush.bf16.msra.mxu2 %v871_v7 }
 0x3c5   :  { %670 = vmatpush.bf16.msrb.mxu1 %v1335_v16 }
 0x3c7   :  { %v1098_v9 = vpop.eup %1097  ;;  %v476_v10 = vpop.xlane.xlu1 %475 }
 0x3c8   :  { %v396_v13 = vmul.f32 %v1098_v9, %v1460_v11  ;;  %v479_v14 = vpop.xlane.xlu0 %478  ;;  %1099 = vrcp.f32 %v476_v10  ;;  %881 = vmatpush.bf16.msra.mxu2 %v870_v8 }
 0x3c9   :  { %1101 = vrcp.f32 %v479_v14  ;;  %v563_v15 = vpop.xlane.xlu2 %562  ;;  %v859_v14 = vld [vmem:[%s1607_s6 + $0x18] sm:$0xff] }
 0x3ca   :  { %v397_v63 = vpack.c.bf16 %v396_v13, %v395_v12  ;;  %1103 = vrcp.f32 %v563_v15  ;;  %v858_v13 = vld [vmem:[%s1607_s6 + $0x10] sm:$0xff] }
 0x3cc   :  { %1015 = vmatmul.msk.bf16.vlgmr.msra.gmra.mxu0 %vm47_vm0, %v397_v63  ;;  %v869_v63 = vpack.c.bf16 %v859_v14, %v858_v13 }
 0x3cd   :  { %757 = vmatpush.bf16.msra.mxu0 %v1309_v55 }
 0x3ce   :  { %v1100_v2 = vpop.eup %1099  ;;  %882 = vmatpush.bf16.msra.mxu2 %v869_v63 }
 0x3cf   :  { %v1102_v17 = vpop.eup %1101  ;;  %v482_v16 = vmul.f32 %v1100_v2, %v1465_v18  ;;  %v566_v57 = vpop.xlane.xlu1 %565 }
 0x3d0   :  { %v483_v58 = vmul.f32 %v1102_v17, %v1467_v19  ;;  %1105 = vrcp.f32 %v566_v57  ;;  %v1104_v11 = vpop.eup %1103  ;;  %v856_v17 = vld [vmem:[%s1607_s6] sm:$0xff] }
 0x3d1   :  { %v569_v44 = vmul.f32 %v1104_v11, %v1471_v20 }
 0x3d2   :  { %v484_v49 = vpack.c.bf16 %v483_v58, %v482_v16  ;;  %v857_v16 = vld [vmem:[%s1607_s6 + $0x8] sm:$0xff] }
 0x3d3   :  { %v868_v57 = vpack.c.bf16 %v857_v16, %v856_v17 }
 0x3d4   :  { %1017 = vmatmul.msk.bf16.vlgmr.msra.gmra.mxu1 %vm47_vm0, %v484_v49 }
 0x3d5   :  { %883 = vmatpush.bf16.msra.mxu2 %v868_v57 }
 0x3d6   :  { %v1106_v53 = vpop.eup %1105 }
 0x3d7   :  { %v570_v22 = vmul.f32 %v1106_v53, %v1480_v33  ;;  %v737_v26 = vpop.xlane.xlu1 %736 }
 0x3d8   :  { %v650_v4 = vpop.xlane.xlu0 %649 }
 0x3d9   :  { %v571_v55 = vpack.c.bf16 %v570_v22, %v569_v44  ;;  %1107 = vrcp.f32 %v650_v4  ;;  %v653_v23 = vpop.xlane.xlu2 %652  ;;  %v1048_v44 = vld [vmem:[%s1605_s5] ss:$0 sm:$0xff] }
 0x3da   :  { %1109 = vrcp.f32 %v653_v23 }
 0x3db   :  { %1111 = vrcp.f32 %v737_v26 }
 0x3dc   :  { %1019 = vmatmul.msk.bf16.vlgmr.msrb.gmra.mxu0 %vm47_vm0, %v571_v55 }
 0x3df   :  { %v1108_v18 = vpop.eup %1107 }
 0x3e0   :  { %v1110_v19 = vpop.eup %1109  ;;  %v656_v30 = vmul.f32 %v1108_v18, %v1487_v27  ;;  %v740_v31 = vpop.xlane.xlu0 %739 }
 0x3e1   :  { %v657_v32 = vmul.f32 %v1110_v19, %v1491_v47  ;;  %1113 = vrcp.f32 %v740_v31  ;;  %v1112_v38 = vpop.eup %1111 }
 0x3e2   :  { %v743_v39 = vmul.f32 %v1112_v38, %v1485_v43 }
 0x3e3   :  { %v658_v20 = vpack.c.bf16 %v657_v32, %v656_v30 }
 0x3e5   :  { %1021 = vmatmul.msk.bf16.vlgmr.msrb.gmra.mxu1 %vm47_vm0, %v658_v20 }
 0x3e7   :  { %v1114_v33 = vpop.eup %1113 }
 0x3e8   :  { %v744_v40 = vmul.f32 %v1114_v33, %v1497_v34 }
 0x3ea   :  { %v745_v41 = vpack.c.bf16 %v744_v40, %v743_v39 }
 0x3ec   :  { %1023 = vmatmul.msk.bf16.vlgmr.msra.gmra.mxu0 %vm47_vm0, %v745_v41 }
 0x408   :  { %v237_v42 = vpop.f32.mrf.mxu0 }
 0x409   :  { %766 = vrot.lane.b32.xlu2 %v237_v42, %s1142_s29 }
 0x410   :  { %v239_v21 = vpop.f32.mrf.mxu0 }
 0x411   :  { %768 = vrot.lane.b32.xlu1 %v239_v21, %s1142_s29 }
 0x441   :  { %v324_v27 = vpop.f32.mrf.mxu1 }
 0x449   :  { %v326_v29 = vpop.f32.mrf.mxu1  ;;  %v411_v45 = vpop.f32.mrf.mxu0 }
 0x44a   :  { %782 = vrot.lane.b32.xlu0 %v411_v45, %s1143_s30 }
 0x451   :  { %v413_v47 = vpop.f32.mrf.mxu0  ;;  %v498_v48 = vpop.f32.mrf.mxu1 }
 0x452   :  { %784 = vrot.lane.b32.xlu1 %v413_v47, %s1143_s30  ;;  %774 = vrot.lane.b32.xlu0 %v324_v27, %s1144_s11 }
 0x459   :  { %v500_v43 = vpop.f32.mrf.mxu1  ;;  %v585_v50 = vpop.f32.mrf.mxu0 }
 0x45a   :  { %798 = vrot.lane.b32.xlu1 %v585_v50, %s1145_s12  ;;  %792 = vrot.lane.b32.xlu0 %v500_v43, %s1146_s13 }
 0x461   :  { %v587_v34 = vpop.f32.mrf.mxu0 }
 0x462   :  { %v672_v54 = vpop.f32.mrf.mxu1  ;;  %800 = vrot.lane.b32.xlu2 %v587_v34, %s1145_s12 }
 0x463   :  { %806 = vrot.lane.b32.xlu0 %v672_v54, %s1147_s14  ;;  %v767_v56 = vpop.permute.xlu2 %766 }
 0x464   :  { %v820_v9 = vsel %vm71_vm1, %v1369_v0, %v767_v56 }
 0x469   :  { %v759_v51 = vpop.f32.mrf.mxu0 }
 0x46a   :  { %v674_v52 = vpop.f32.mrf.mxu1  ;;  %776 = vrot.lane.b32.xlu2 %v326_v29, %s1144_s11 }
 0x46b   :  { %808 = vrot.lane.b32.xlu1 %v674_v52, %s1147_s14 }
 0x471   :  { %v761_v62 = vpop.f32.mrf.mxu0 }
 0x472   :  { %790 = vrot.lane.b32.xlu2 %v498_v48, %s1146_s13  ;;  %816 = vrot.lane.b32.xlu0 %v761_v62, %s1148_s15  ;;  %v1049_v48 = vld [vmem:[%s1606_s8] ss:$0 sm:$0xff] }
 0x47a   :  { %814 = vrot.lane.b32.xlu2 %v759_v51, %s1148_s15 }
 0x483   :  { %v769_v61 = vpop.permute.xlu1 %768 }
 0x484   :  { %v821_v4 = vsel %vm71_vm1, %v1371_v3, %v769_v61 }
 0x4bc   :  { %v783_v59 = vpop.permute.xlu0 %782  ;;  %v801_v60 = vpop.permute.xlu2 %800 }
 0x4c4   :  { %v775_v1 = vpop.permute.xlu0 %774  ;;  %v777_v5 = vpop.permute.xlu2 %776 }
 0x4c5   :  { %v785_v6 = vpop.permute.xlu1 %784  ;;  %v822_v12 = vsel %vm47_vm0, %v820_v9, %v775_v1  ;;  %v823_v55 = vsel %vm47_vm0, %v821_v4, %v777_v5 }
 0x4c6   :  { %v825_v15 = vsel %vm824_vm4, %v822_v12, %v783_v59  ;;  %v826_v26 = vsel %vm824_vm4, %v823_v55, %v785_v6  ;;  %v864_v59 = vld [vmem:[%s1608_s7] sm:$0x1] }
 0x4c7   :  { %v1050_v55 = vld [vmem:[%s1609_s9] ss:$0 sm:$0xff] }
 0x4cc   :  { %v793_v46 = vpop.permute.xlu0 %792  ;;  %v791_v10 = vpop.permute.xlu2 %790 }
 0x4cd   :  { %v799_v2 = vpop.permute.xlu1 %798  ;;  %v828_v0 = vsel %vm827_vm5, %v825_v15, %v791_v10  ;;  %v829_v18 = vsel %vm827_vm5, %v826_v26, %v793_v46 }
 0x4ce   :  { %v831_v58 = vsel %vm830_vm6, %v828_v0, %v799_v2  ;;  %v832_v31 = vsel %vm830_vm6, %v829_v18, %v801_v60  ;;  %v903_v60 = vpack.c.bf16 %v864_v59, %v864_v59 }
 0x4d4   :  { %v815_v11 = vpop.permute.xlu2 %814 }
 0x4d5   :  { %v807_v49 = vpop.permute.xlu0 %806 }
 0x4d6   :  { %v834_v53 = vsel %vm833_vm7, %v831_v58, %v807_v49 }
 0x4d7   :  { %v837_v22 = vsel %vm836_vm8, %v834_v53, %v815_v11 }
 0x4d8   :  { %v842_v23 = vadd.f32 %v1048_v44, %v837_v22 }
 0x4da   :  { %v846_v19 = vmin.f32 %v842_v23, 0.0  ;;  %vm844_vm1 = vcmp.gt.f32.partialorder %v842_v23, 0.0 }
 0x4dc   :  { %v848_v20 = vmul.f32 1.442695, %v846_v19 }
 0x4dd   :  { %v809_v30 = vpop.permute.xlu1 %808 }
 0x4de   :  { %v835_v32 = vsel %vm833_vm7, %v832_v31, %v809_v30  ;;  %1115 = vpow2.f32 %v848_v20 }
 0x4e4   :  { %v817_v38 = vpop.permute.xlu0 %816  ;;  %v1116_v41 = vpop.eup %1115 }
 0x4e5   :  { %v838_v33 = vsel %vm836_vm8, %v835_v32, %v817_v38  ;;  %v1024_v42 = vadd.f32 -1.0, %v1116_v41 }
 0x4e6   :  { %v843_v39 = vadd.f32 %v1048_v44, %v838_v33 }
 0x4e7   :  { %v854_v29 = vsel %vm844_vm1, %v842_v23, %v1024_v42 }
 0x4e8   :  { %v847_v3 = vmin.f32 %v843_v39, 0.0  ;;  %vm845_vm9 = vcmp.gt.f32.partialorder %v843_v39, 0.0 }
 0x4ea   :  { %v850_v40 = vmul.f32 1.442695, %v847_v3 }
 0x4ec   :  { %1117 = vpow2.f32 %v850_v40 }
 0x4f2   :  { %v1118_v21 = vpop.eup %1117 }
 0x4f3   :  { %v1025_v27 = vadd.f32 -1.0, %v1118_v21 }
 0x4f5   :  { %v855_v45 = vsel %vm845_vm9, %v843_v39, %v1025_v27 }
 0x4f6   :  { %v867_v47 = vpack.c.bf16 %v855_v45, %v854_v29 }
 0x4f8   :  { %1026 = vmatmul.msk.bf16.vlgmr.msra.gmra.mxu2 %vm872_vm10, %v867_v47 }
 0x57b   :  { %v885_v43 = vpop.f32.mrf.mxu2 }
 0x57c   :  { %v894_v50 = vmul.f32 %v1049_v48, %v885_v43 }
 0x57e   :  { %v897_v34 = vsel %vm896_vm11, %v894_v50, 0.0 }
 0x57f   :  { %898 = vadd.xlane.f32.xlu1 %v897_v34 }
 0x583   :  { %v887_v54 = vpop.f32.mrf.mxu2 }
 0x584   :  { %v890_v51 = vpack.c.bf16 %v887_v54, %v885_v43  ;;  %v895_v52 = vmul.f32 %v1049_v48, %v887_v54 }
 0x586   :  { %v908_v62 = vsel %vm896_vm11, %v890_v51, 0  ;;  %970 = vmatpush.bf16.msra.mxu3 %v890_v51  ;;  %v900_v56 = vsel %vm896_vm11, %v895_v52, 0.0 }
 0x587   :  { %901 = vadd.xlane.f32.xlu2 %v900_v56  ;;  %917 = vmatpush.bf16.xpose.msra.mxu1 %v908_v62 }
 0x58e   :  { %1027 = vmatmul.msk.bf16.vlgmr.msra.gmra.mxu1 %vm896_vm11, %v903_v60 }
 0x5f2   :  { %v899_v5 = vpop.xlane.xlu1 %898 }
 0x5fa   :  { %v902_v24 = vpop.xlane.xlu2 %901 }
 0x60b   :  { %v919_v61 = vpop.f32.mrf.mxu1 }
 0x60c   :  { %v923_v1 = vperm.slane %v919_v61, 0 }
 0x60e   :  { %v924_v25 = vadd.f32 %v923_v1, %v899_v5  ;;  %v925_v6 = vadd.f32 %v923_v1, %v902_v24 }
 0x610   :  { %v928_v7 = vmul.f32 0.2, %v924_v25  ;;  %v929_v35 = vmul.f32 0.2, %v925_v6  ;;  %vm927_vm12 = vcmp.gt.f32.partialorder %v925_v6, 0.0  ;;  %vm926_vm13 = vcmp.gt.f32.partialorder %v924_v25, 0.0 }
 0x612   :  { %v931_v37 = vsel %vm927_vm12, %v925_v6, %v929_v35  ;;  %v930_v46 = vsel %vm926_vm13, %v924_v25, %v928_v7 }
 0x613   :  { %v921_v8 = vpop.f32.mrf.mxu1  ;;  %v933_v9 = vadd.f32 %v1269_v36, %v931_v37  ;;  %v932_v10 = vadd.f32 %v1265_v28, %v930_v46 }
 0x615   :  { %v937_v12 = vsel %vm47_vm0, %v933_v9, -inf  ;;  %v934_v13 = vsel %vm47_vm0, %v932_v10, -inf }
 0x616   :  { %938 = vmax.xlane.f32.xlu1 %v937_v12  ;;  %935 = vmax.xlane.f32.xlu0 %v934_v13 }
 0x689   :  { %v939_v14 = vpop.xlane.xlu1 %938  ;;  %v936_v63 = vpop.xlane.xlu0 %935 }
 0x68a   :  { %v941_v15 = vsub.f32 %v933_v9, %v939_v14  ;;  %v940_v2 = vsub.f32 %v932_v10, %v936_v63 }
 0x68c   :  { %v944_v0 = vmul.f32 1.442695, %v941_v15  ;;  %v942_v17 = vmul.f32 1.442695, %v940_v2 }
 0x68e   :  { %1119 = vpow2.f32 %v944_v0 }
 0x68f   :  { %1121 = vpow2.f32 %v942_v17 }
 0x694   :  { %v1120_v16 = vpop.eup %1119 }
 0x695   :  { %v1122_v57 = vpop.eup %1121  ;;  %v949_v36 = vsel %vm47_vm0, %v1120_v16, 0.0 }
 0x696   :  { %950 = vadd.xlane.f32.xlu0 %v949_v36  ;;  %v946_v28 = vsel %vm47_vm0, %v1122_v57, 0.0 }
 0x697   :  { %947 = vadd.xlane.f32.xlu2 %v946_v28 }
 0x709   :  { %v951_v58 = vpop.xlane.xlu0 %950 }
 0x70a   :  { %v948_v49 = vpop.xlane.xlu2 %947  ;;  %1123 = vrcp.f32 %v951_v58 }
 0x70b   :  { %1125 = vrcp.f32 %v948_v49 }
 0x710   :  { %v1124_v11 = vpop.eup %1123 }
 0x711   :  { %v1126_v53 = vpop.eup %1125  ;;  %v955_v44 = vmul.f32 %v1124_v11, %v1120_v16 }
 0x712   :  { %v954_v22 = vmul.f32 %v1126_v53, %v1122_v57 }
 0x714   :  { %v956_v4 = vpack.c.bf16 %v955_v44, %v954_v22 }
 0x716   :  { %1028 = vmatmul.msk.bf16.vlgmr.msra.gmra.mxu3 %vm47_vm0, %v956_v4 }
 0x799   :  { %v972_v23 = vpop.f32.mrf.mxu3 }
 0x79a   :  { %v973_v26 = vadd.f32 %v1050_v55, %v972_v23 }
 0x79c   :  { %v977_v18 = vsel %vm896_vm11, %v973_v26, -inf }
 0x79d   :  { %978 = vmax.xlane.f32.xlu1 %v977_v18 }
 0x7a1   :  { %v974_v19 = vpop.f32.mrf.mxu3 }
 0x7a2   :  { %v975_v30 = vadd.f32 %v1050_v55, %v974_v19 }
 0x7a4   :  { %v980_v31 = vsel %vm896_vm11, %v975_v30, -inf }
 0x7a5   :  { %981 = vmax.xlane.f32.xlu2 %v980_v31 }
 0x810   :  { %v979_v32 = vpop.xlane.xlu1 %978 }
 0x811   :  { %v983_v20 = vsub.f32 %v973_v26, %v979_v32 }
 0x813   :  { %v985_v38 = vmul.f32 1.442695, %v983_v20 }
 0x815   :  { %1127 = vpow2.f32 %v985_v38 }
 0x818   :  { %v982_v33 = vpop.xlane.xlu2 %981 }
 0x819   :  { %v984_v39 = vsub.f32 %v975_v30, %v982_v33 }
 0x81b   :  { %v1128_v3 = vpop.eup %1127  ;;  %v987_v40 = vmul.f32 1.442695, %v984_v39 }
 0x81c   :  { %v989_v41 = vsel %vm896_vm11, %v1128_v3, 0.0 }
 0x81d   :  { %1129 = vpow2.f32 %v987_v40  ;;  %990 = vadd.xlane.f32.xlu0 %v989_v41 }
 0x823   :  { %v1130_v42 = vpop.eup %1129 }
 0x824   :  { %v992_v21 = vsel %vm896_vm11, %v1130_v42, 0.0 }
 0x825   :  { %993 = vadd.xlane.f32.xlu1 %v992_v21 }
 0x890   :  { %v991_v27 = vpop.xlane.xlu0 %990 }
 0x891   :  { %1131 = vlog2.f32 %v991_v27 }
 0x897   :  { %v1132_v29 = vpop.eup %1131 }
 0x898   :  { %v996_v45 = vmul.f32 0.6931472, %v1132_v29  ;;  %v994_v47 = vpop.xlane.xlu1 %993 }
 0x899   :  { %1133 = vlog2.f32 %v994_v47 }
 0x89a   :  { %v999_v48 = vsub.f32 %v983_v20, %v996_v45 }
 0x89c   :  { %1001 = vst.msk [vmem:[%s1610_s10] sm:$0xff] %vm896_vm11, %v999_v48 }
 0x89f   :  { %v1134_v43 = vpop.eup %1133 }
 0x8a0   :  { %v998_v50 = vmul.f32 0.6931472, %v1134_v43 }
 0x8a2   :  { %v1000_v34 = vsub.f32 %v984_v39, %v998_v50 }
 0x8a4   :  { %1002 = vst.msk [vmem:[%s1610_s10 + $0x8] sm:$0xff] %vm896_vm11, %v1000_v34 }

</bundles_post_ra>
